<compile_context>
chip_gen: v6e
topology: v6e:2x2x1
jax: 0.10.0
libtpu: 0.0.40
codegen_flags: <defaults>
</compile_context>

<pallas_src>
import jax
import jax.numpy as jnp
from jax.experimental import pallas as pl
from jax.experimental.pallas import tpu as pltpu

NEG_SLOPE = 0.2
BN_EPS = 1e-5
LANE = 128


def _leaky(x):
    # PyTorch LeakyReLU(negative_slope=0.2)
    return jnp.where(x >= 0, x, NEG_SLOPE * x)


def _cat_matmul(parts, part_dims, w_ref):
    """(torch.cat(parts, dim=1)) @ W realized as a sum of matmuls over static,
    tile-aligned row slices of the weight ref (same result up to accumulation
    order)."""
    total = sum(part_dims)
    acc = None
    off = 0
    for arr, d in zip(parts, part_dims):
        w = w_ref[...] if (off == 0 and d == total) else w_ref[off:off + d, :]
        t = jnp.dot(arr, w, preferred_element_type=jnp.float32)
        acc = t if acc is None else acc + t
        off += d
    return acc


def ffh_evaluator_kernel(x_ref,
                         w13_1, b13_1, w2_1, b2_1,
                         w13_2, b13_2, w2_2, b2_2,
                         w13_3, b13_3, w2_3, b2_3,
                         out_w, out_b,
                         out_ref):
    x = x_ref[...]                       # (TB, Dpad) bf16; model bn1 folded into weights
    Dp = x.shape[1]
    H = w2_1.shape[0]                    # ResBlock hidden width
    N = w2_1.shape[1]                    # ResBlock output width

    def res_block(parts, dims, w13, b13, w2, b2):
        # fc1 (in-block bn1 folded) and fc3 fused into one K-sweep; columns
        # split afterwards into main / skip pre-activations.
        pre = _cat_matmul(parts, dims, w13) + b13[...]            # (TB, H+N) f32
        h = _leaky(pre[:, :H])
        skip = _leaky(pre[:, H:])
        h = jnp.dot(h.astype(jnp.bfloat16), w2[...],
                    preferred_element_type=jnp.float32) + b2[...]  # bn2 folded
        return _leaky(skip + h)

    # Dropout(0.3) between blocks is the identity in eval mode -> no-op.
    x1 = res_block([x], [Dp], w13_1, b13_1, w2_1, b2_1)
    x2 = res_block([x1.astype(jnp.bfloat16), x], [N, Dp], w13_2, b13_2, w2_2, b2_2)
    x3 = res_block([x2.astype(jnp.bfloat16), x], [N, Dp], w13_3, b13_3, w2_3, b2_3)

    # out_success: Linear(N -> 1) as VPU mul + XLU reduce (off the MXU path).
    logits = jnp.sum(x3 * out_w[...], axis=-1, keepdims=True) + out_b[...]
    # Lane-dense, unmasked store: broadcast into the full (TB, 128) block.
    out_ref[...] = jnp.broadcast_to(jax.nn.sigmoid(logits), out_ref.shape)


def _choose_tile(B):
    """Batch tile: prefer MXU-friendly multiples of 256, fall back to smaller
    divisors, else pad the batch up to a multiple of the tile."""
    for cand in (512, 256, 128, 64, 32, 16, 8):
        if B % cand == 0:
            return cand, B
    tb = 256 if B > 256 else 8 * pl.cdiv(B, 8)
    return tb, tb * pl.cdiv(B, tb)


def _pallas_forward(x, params, tb, use_buffered):
    Bp, Dp = x.shape
    grid = (Bp // tb,)
    H, N = params[2].shape               # rb1 fc2 weight: (hidden, Fout)

    def resident_spec(arr):
        # Constant index_map: each weight is DMA'd once and stays VMEM-resident.
        if use_buffered:
            # Block never changes -> double-buffering would only duplicate it.
            return pl.BlockSpec(arr.shape, lambda i: (0,) * arr.ndim,
                                pipeline_mode=pl.Buffered(1))
        return pl.BlockSpec(arr.shape, lambda i: (0,) * arr.ndim)

    in_specs = [pl.BlockSpec((tb, Dp), lambda i: (i, 0))]
    in_specs += [resident_spec(p) for p in params]
    out_spec = pl.BlockSpec((tb, LANE), lambda i: (i, 0))

    # VMEM budget: resident weights (x1 or x2 buffers), double-buffered x/out
    # tiles, activation temporaries, headroom — capped by the chip's capacity.
    param_bytes = sum(int(p.size) * p.dtype.itemsize for p in params)
    weight_bufs = 1 if use_buffered else 2
    tile_bytes = 2 * (tb * Dp * 2 + tb * LANE * 4)
    act_bytes = 6 * tb * (H + N) * 4
    footprint = weight_bufs * param_bytes + tile_bytes + act_bytes + (8 << 20)
    try:
        vmem_cap = int(pltpu.get_tpu_info().vmem_capacity_bytes)
    except Exception:
        vmem_cap = 64 << 20               # v7x-safe fallback
    vmem_limit = max(16 << 20, min(vmem_cap - (8 << 20), max(32 << 20, footprint)))

    # Advisory cost estimate so XLA schedules the surrounding ops sensibly.
    flops = 2 * Bp * (Dp * (H + N) + 2 * (N + Dp) * (H + N) + 3 * H * N + N)
    cost = pl.CostEstimate(flops=int(flops), transcendentals=int(Bp),
                           bytes_accessed=int(param_bytes + x.size * 2 + Bp * LANE * 4))

    return pl.pallas_call(
        ffh_evaluator_kernel,
        out_shape=jax.ShapeDtypeStruct((Bp, LANE), jnp.float32),
        grid_spec=pltpu.PrefetchScalarGridSpec(
            num_scalar_prefetch=0,
            grid=grid,
            in_specs=in_specs,
            out_specs=out_spec,
        ),
        compiler_params=pltpu.CompilerParams(
            dimension_semantics=("parallel",),
            vmem_limit_bytes=int(vmem_limit),
        ),
        cost_estimate=cost,
    )(x, *params)


def ffh_evaluator_forward(data, params):
    """set_input (rot_matrix.view(B,-1)) + concat + batch-gridded pallas_call.
    `params` comes from prepare_kernel_params (BN folded, D padded, bf16)."""
    bps = data["bps_object"].astype(jnp.float32)
    B = bps.shape[0]
    rot = data["rot_matrix"].astype(jnp.float32).reshape(B, -1)
    transl = data["transl"].astype(jnp.float32)
    x = jnp.concatenate([bps, rot, transl], axis=1)           # (B, D)
    D = x.shape[1]

    Dp = params[0].shape[0]                                   # rb1 weight rows == padded D
    assert Dp == LANE * pl.cdiv(D, LANE), "params not prepared for this input width"
    tb, Bp = _choose_tile(B)
    x = jnp.pad(x, ((0, Bp - B), (0, Dp - D)))                # batch / lane tile padding
    x = x.astype(jnp.bfloat16)                                # bn1 already folded into weights

    try:
        out = _pallas_forward(x, params, tb, use_buffered=True)
    except Exception:
        # TODO(synk): pl.Buffered(1) (single-buffered resident weights) not
        # supported by this jax version; fall back to default double-buffering.
        out = _pallas_forward(x, params, tb, use_buffered=False)

    return out[:B, :1]


def make_raw_params(key, D, n_neurons, rb_hidden):
    """Deterministic synthetic parameters mirroring the PyTorch module layout
    (eval mode: BatchNorm uses running statistics)."""
    keys = iter(jax.random.split(key, 64))

    def nrm(shape, scale=0.05):
        return scale * jax.random.normal(next(keys), shape, dtype=jnp.float32)

    def bn(C):
        return dict(gamma=1.0 + nrm((C,), 0.1), beta=nrm((C,), 0.1),
                    mean=nrm((C,), 0.1), var=1.0 + jnp.abs(nrm((C,), 0.1)))

    def linear(fin, fout):
        return nrm((fin, fout)), nrm((fout,))

    def resblock(fin, fout, hidden):
        fc1_w, fc1_b = linear(fin, hidden)
        fc2_w, fc2_b = linear(hidden, fout)
        fc3_w, fc3_b = linear(fin, fout)          # Fin != Fout for every block
        return dict(fc1_w=fc1_w, fc1_b=fc1_b, bn1=bn(hidden),
                    fc2_w=fc2_w, fc2_b=fc2_b, bn2=bn(fout),
                    fc3_w=fc3_w, fc3_b=fc3_b)

    return dict(
        bn1=bn(D),
        rb1=resblock(D, n_neurons, rb_hidden),
        rb2=resblock(D + n_neurons, n_neurons, rb_hidden),
        rb3=resblock(D + n_neurons, n_neurons, rb_hidden),
        out_w=nrm((n_neurons, 1)),
        out_b=nrm((1,)),
    )


def prepare_kernel_params(rp, D, n_neurons):
    """Host-side parameter prep (exact folds, eval-mode only):
      * every BatchNorm folded into the adjacent Linear via running stats;
      * the model-level bn1 folded into the X0 rows of fc1/fc3 of all blocks,
        so the kernel consumes the raw concatenated input directly (bf16);
      * D zero-padded up to a multiple of 128 for tile-aligned K slices;
      * fc1 and fc3 concatenated along the output dim (one K-sweep per block);
      * matmul weights bf16, biases / out head f32."""
    Dp = LANE * pl.cdiv(D, LANE)
    s0 = rp["bn1"]["gamma"] / jnp.sqrt(rp["bn1"]["var"] + BN_EPS)
    sh0 = rp["bn1"]["beta"] - rp["bn1"]["mean"] * s0

    def bn_fold(p):
        s = p["gamma"] / jnp.sqrt(p["var"] + BN_EPS)
        return s, p["beta"] - p["mean"] * s

    def fold_block(p, n_prev):
        s1, sh1 = bn_fold(p["bn1"])
        w1 = p["fc1_w"] * s1[None, :]
        b1 = p["fc1_b"] * s1 + sh1
        s2, sh2 = bn_fold(p["bn2"])
        w2 = p["fc2_w"] * s2[None, :]
        b2 = p["fc2_b"] * s2 + sh2
        w3, b3 = p["fc3_w"], p["fc3_b"]

        def fold_bn0_and_pad(w, b):
            # Trailing D rows multiply X0 = x*s0 + sh0 -> fold the scale into
            # the rows, the shift into the bias, then zero-pad rows D..Dp.
            wx = w[n_prev:, :]
            b = b + sh0 @ wx
            wx = wx * s0[:, None]
            pad = jnp.zeros((Dp - D, w.shape[1]), jnp.float32)
            return jnp.concatenate([w[:n_prev, :], wx, pad], axis=0), b

        w1, b1 = fold_bn0_and_pad(w1, b1)
        w3, b3 = fold_bn0_and_pad(w3, b3)
        w13 = jnp.concatenate([w1, w3], axis=1).astype(jnp.bfloat16)
        b13 = jnp.concatenate([b1, b3])[None, :]
        return [w13, b13, w2.astype(jnp.bfloat16), b2[None, :]]

    params = []
    params += fold_block(rp["rb1"], 0)
    params += fold_block(rp["rb2"], n_neurons)
    params += fold_block(rp["rb3"], n_neurons)
    params += [jnp.transpose(rp["out_w"]), rp["out_b"].reshape(1, 1)]   # f32 head
    return params


def reference_forward(data, rp):
    """Pure-JAX f32, unfolded, eval-mode reference of the PyTorch module."""
    bps = data["bps_object"].astype(jnp.float32)
    B = bps.shape[0]
    rot = data["rot_matrix"].astype(jnp.float32).reshape(B, -1)
    x = jnp.concatenate([bps, rot, data["transl"].astype(jnp.float32)], axis=1)

    def bn_eval(v, p):
        return (v - p["mean"]) / jnp.sqrt(p["var"] + BN_EPS) * p["gamma"] + p["beta"]

    def res_block(xin, p):
        skip = _leaky(xin @ p["fc3_w"] + p["fc3_b"])
        h = _leaky(bn_eval(xin @ p["fc1_w"] + p["fc1_b"], p["bn1"]))
        h = bn_eval(h @ p["fc2_w"] + p["fc2_b"], p["bn2"])
        return _leaky(skip + h)

    x0 = bn_eval(x, rp["bn1"])
    x1 = res_block(x0, rp["rb1"])
    x2 = res_block(jnp.concatenate([x1, x0], axis=1), rp["rb2"])
    x3 = res_block(jnp.concatenate([x2, x0], axis=1), rp["rb3"])
    return jax.nn.sigmoid(x3 @ rp["out_w"] + rp["out_b"])


if __name__ == "__main__":
    # Small shapes consistent with the module (in_pose = 9 + 3 = 12).
    B = 10               # exercises batch padding (10 -> tile 16)
    in_bps = 100         # scaled down from 4096; D = 112 -> padded to 128
    in_pose = 12
    n_neurons = 64       # scaled down from 512 (ResBlock Fout)
    rb_hidden = 64       # scaled down from ResBlock default 256

    key = jax.random.PRNGKey(0)
    kp, kb, kr, kt = jax.random.split(key, 4)
    D = in_bps + in_pose
    raw = make_raw_params(kp, D, n_neurons, rb_hidden)
    params = prepare_kernel_params(raw, D, n_neurons)

    data = {
        "bps_object": jax.random.normal(kb, (B, in_bps), dtype=jnp.float32),
        "rot_matrix": jax.random.normal(kr, (B, 3, 3), dtype=jnp.float32),
        "transl": jax.random.normal(kt, (B, 3), dtype=jnp.float32),
    }

    # TODO(synk): training-mode Dropout(0.3) / batch-statistics BatchNorm not
    # implemented; kernel follows eval() semantics (cfg.is_train = False path).
    p_success = ffh_evaluator_forward(data, params)
    p_success = jax.block_until_ready(p_success)
    assert p_success.shape == (B, 1)
    assert bool(jnp.all((p_success >= 0.0) & (p_success <= 1.0)))

    # Validate against the unfolded f32 eval-mode reference of the PyTorch math.
    ref = reference_forward(data, raw)
    err = float(jnp.max(jnp.abs(p_success - ref)))
    assert err < 2e-2, f"mismatch vs reference: {err}"
    print("KERNEL_OK")
</pallas_src>

<mosaic_0001>
module attributes {stable_mosaic.version = 11 : i64} {
  func.func @ffh_evaluator_kernel(%arg0: i32, %arg1: memref<16x128xbf16, #tpu.memory_space<vmem>>, %arg2: memref<128x128xbf16, #tpu.memory_space<vmem>>, %arg3: memref<1x128xf32, #tpu.memory_space<vmem>>, %arg4: memref<64x64xbf16, #tpu.memory_space<vmem>>, %arg5: memref<1x64xf32, #tpu.memory_space<vmem>>, %arg6: memref<192x128xbf16, #tpu.memory_space<vmem>>, %arg7: memref<1x128xf32, #tpu.memory_space<vmem>>, %arg8: memref<64x64xbf16, #tpu.memory_space<vmem>>, %arg9: memref<1x64xf32, #tpu.memory_space<vmem>>, %arg10: memref<192x128xbf16, #tpu.memory_space<vmem>>, %arg11: memref<1x128xf32, #tpu.memory_space<vmem>>, %arg12: memref<64x64xbf16, #tpu.memory_space<vmem>>, %arg13: memref<1x64xf32, #tpu.memory_space<vmem>>, %arg14: memref<1x64xf32, #tpu.memory_space<vmem>>, %arg15: memref<1x1xf32, #tpu.memory_space<vmem>>, %arg16: memref<16x128xf32, #tpu.memory_space<vmem>>) attributes {dimension_semantics = [#tpu.dimension_semantics<parallel>], iteration_bounds = array<i64: 1>, scalar_prefetch = 0 : i64, scratch_operands = 0 : i64, tpu.core_type = #tpu.core_type<tc>, window_params = [{transform_indices = @transform_0, window_bounds = array<i64: 16, 128>}, {pipeline_mode = #tpu.pipeline_mode<synchronous>, transform_indices = @transform_1, window_bounds = array<i64: 128, 128>}, {pipeline_mode = #tpu.pipeline_mode<synchronous>, transform_indices = @transform_2, window_bounds = array<i64: 1, 128>}, {pipeline_mode = #tpu.pipeline_mode<synchronous>, transform_indices = @transform_3, window_bounds = array<i64: 64, 64>}, {pipeline_mode = #tpu.pipeline_mode<synchronous>, transform_indices = @transform_4, window_bounds = array<i64: 1, 64>}, {pipeline_mode = #tpu.pipeline_mode<synchronous>, transform_indices = @transform_5, window_bounds = array<i64: 192, 128>}, {pipeline_mode = #tpu.pipeline_mode<synchronous>, transform_indices = @transform_6, window_bounds = array<i64: 1, 128>}, {pipeline_mode = #tpu.pipeline_mode<synchronous>, transform_indices = @transform_7, window_bounds = array<i64: 64, 64>}, {pipeline_mode = #tpu.pipeline_mode<synchronous>, transform_indices = @transform_8, window_bounds = array<i64: 1, 64>}, {pipeline_mode = #tpu.pipeline_mode<synchronous>, transform_indices = @transform_9, window_bounds = array<i64: 192, 128>}, {pipeline_mode = #tpu.pipeline_mode<synchronous>, transform_indices = @transform_10, window_bounds = array<i64: 1, 128>}, {pipeline_mode = #tpu.pipeline_mode<synchronous>, transform_indices = @transform_11, window_bounds = array<i64: 64, 64>}, {pipeline_mode = #tpu.pipeline_mode<synchronous>, transform_indices = @transform_12, window_bounds = array<i64: 1, 64>}, {pipeline_mode = #tpu.pipeline_mode<synchronous>, transform_indices = @transform_13, window_bounds = array<i64: 1, 64>}, {pipeline_mode = #tpu.pipeline_mode<synchronous>, transform_indices = @transform_14, window_bounds = array<i64: 1, 1>}, {transform_indices = @transform_15, window_bounds = array<i64: 16, 128>}]} {
    %c0 = arith.constant 0 : index
    %c0_0 = arith.constant 0 : index
    %0 = vector.load %arg1[%c0, %c0_0] : memref<16x128xbf16, #tpu.memory_space<vmem>>, vector<16x128xbf16>
    %c0_1 = arith.constant 0 : index
    %c0_2 = arith.constant 0 : index
    %1 = vector.load %arg2[%c0_1, %c0_2] : memref<128x128xbf16, #tpu.memory_space<vmem>>, vector<128x128xbf16>
    %cst = arith.constant dense<0.000000e+00> : vector<16x128xf32>
    %2 = tpu.matmul %0, %1, %cst {dimension_numbers = #tpu.dot_dimension_numbers<[1], [0], [0], [1], [0, 0, 1, 1], [], []>} : vector<16x128xbf16>, vector<128x128xbf16>, vector<16x128xf32> -> vector<16x128xf32>
    %c0_3 = arith.constant 0 : index
    %c0_4 = arith.constant 0 : index
    %3 = vector.load %arg3[%c0_3, %c0_4] : memref<1x128xf32, #tpu.memory_space<vmem>>, vector<1x128xf32>
    %4 = vector.broadcast %3 : vector<1x128xf32> to vector<16x128xf32>
    %5 = arith.addf %2, %4 : vector<16x128xf32>
    %6 = vector.extract_strided_slice %5 {offsets = [0, 0], sizes = [16, 64], strides = [1, 1]} : vector<16x128xf32> to vector<16x64xf32>
    %cst_5 = arith.constant 0.000000e+00 : f32
    %7 = vector.broadcast %cst_5 : f32 to vector<16x64xf32>
    %8 = arith.cmpf oge, %6, %7 : vector<16x64xf32>
    %cst_6 = arith.constant 2.000000e-01 : f32
    %9 = vector.broadcast %cst_6 : f32 to vector<16x64xf32>
    %10 = arith.mulf %9, %6 : vector<16x64xf32>
    %11 = arith.select %8, %6, %10 : vector<16x64xi1>, vector<16x64xf32>
    %12 = vector.extract_strided_slice %5 {offsets = [0, 64], sizes = [16, 64], strides = [1, 1]} : vector<16x128xf32> to vector<16x64xf32>
    %cst_7 = arith.constant 0.000000e+00 : f32
    %13 = vector.broadcast %cst_7 : f32 to vector<16x64xf32>
    %14 = arith.cmpf oge, %12, %13 : vector<16x64xf32>
    %cst_8 = arith.constant 2.000000e-01 : f32
    %15 = vector.broadcast %cst_8 : f32 to vector<16x64xf32>
    %16 = arith.mulf %15, %12 : vector<16x64xf32>
    %17 = arith.select %14, %12, %16 : vector<16x64xi1>, vector<16x64xf32>
    %18 = arith.truncf %11 : vector<16x64xf32> to vector<16x64xbf16>
    %c0_9 = arith.constant 0 : index
    %c0_10 = arith.constant 0 : index
    %19 = vector.load %arg4[%c0_9, %c0_10] : memref<64x64xbf16, #tpu.memory_space<vmem>>, vector<64x64xbf16>
    %cst_11 = arith.constant dense<0.000000e+00> : vector<16x64xf32>
    %20 = tpu.matmul %18, %19, %cst_11 {dimension_numbers = #tpu.dot_dimension_numbers<[1], [0], [0], [1], [0, 0, 1, 1], [], []>} : vector<16x64xbf16>, vector<64x64xbf16>, vector<16x64xf32> -> vector<16x64xf32>
    %c0_12 = arith.constant 0 : index
    %c0_13 = arith.constant 0 : index
    %21 = vector.load %arg5[%c0_12, %c0_13] : memref<1x64xf32, #tpu.memory_space<vmem>>, vector<1x64xf32>
    %22 = vector.broadcast %21 : vector<1x64xf32> to vector<16x64xf32>
    %23 = arith.addf %20, %22 : vector<16x64xf32>
    %24 = arith.addf %17, %23 : vector<16x64xf32>
    %cst_14 = arith.constant 0.000000e+00 : f32
    %25 = vector.broadcast %cst_14 : f32 to vector<16x64xf32>
    %26 = arith.cmpf oge, %24, %25 : vector<16x64xf32>
    %cst_15 = arith.constant 2.000000e-01 : f32
    %27 = vector.broadcast %cst_15 : f32 to vector<16x64xf32>
    %28 = arith.mulf %27, %24 : vector<16x64xf32>
    %29 = arith.select %26, %24, %28 : vector<16x64xi1>, vector<16x64xf32>
    %30 = arith.truncf %29 : vector<16x64xf32> to vector<16x64xbf16>
    %c0_16 = arith.constant 0 : index
    %c0_17 = arith.constant 0 : index
    %31 = vector.load %arg6[%c0_16, %c0_17] : memref<192x128xbf16, #tpu.memory_space<vmem>>, vector<64x128xbf16>
    %cst_18 = arith.constant dense<0.000000e+00> : vector<16x128xf32>
    %32 = tpu.matmul %30, %31, %cst_18 {dimension_numbers = #tpu.dot_dimension_numbers<[1], [0], [0], [1], [0, 0, 1, 1], [], []>} : vector<16x64xbf16>, vector<64x128xbf16>, vector<16x128xf32> -> vector<16x128xf32>
    %c64 = arith.constant 64 : index
    %c0_19 = arith.constant 0 : index
    %33 = vector.load %arg6[%c64, %c0_19] : memref<192x128xbf16, #tpu.memory_space<vmem>>, vector<128x128xbf16>
    %cst_20 = arith.constant dense<0.000000e+00> : vector<16x128xf32>
    %34 = tpu.matmul %0, %33, %cst_20 {dimension_numbers = #tpu.dot_dimension_numbers<[1], [0], [0], [1], [0, 0, 1, 1], [], []>} : vector<16x128xbf16>, vector<128x128xbf16>, vector<16x128xf32> -> vector<16x128xf32>
    %35 = arith.addf %32, %34 : vector<16x128xf32>
    %c0_21 = arith.constant 0 : index
    %c0_22 = arith.constant 0 : index
    %36 = vector.load %arg7[%c0_21, %c0_22] : memref<1x128xf32, #tpu.memory_space<vmem>>, vector<1x128xf32>
    %37 = vector.broadcast %36 : vector<1x128xf32> to vector<16x128xf32>
    %38 = arith.addf %35, %37 : vector<16x128xf32>
    %39 = vector.extract_strided_slice %38 {offsets = [0, 0], sizes = [16, 64], strides = [1, 1]} : vector<16x128xf32> to vector<16x64xf32>
    %cst_23 = arith.constant 0.000000e+00 : f32
    %40 = vector.broadcast %cst_23 : f32 to vector<16x64xf32>
    %41 = arith.cmpf oge, %39, %40 : vector<16x64xf32>
    %cst_24 = arith.constant 2.000000e-01 : f32
    %42 = vector.broadcast %cst_24 : f32 to vector<16x64xf32>
    %43 = arith.mulf %42, %39 : vector<16x64xf32>
    %44 = arith.select %41, %39, %43 : vector<16x64xi1>, vector<16x64xf32>
    %45 = vector.extract_strided_slice %38 {offsets = [0, 64], sizes = [16, 64], strides = [1, 1]} : vector<16x128xf32> to vector<16x64xf32>
    %cst_25 = arith.constant 0.000000e+00 : f32
    %46 = vector.broadcast %cst_25 : f32 to vector<16x64xf32>
    %47 = arith.cmpf oge, %45, %46 : vector<16x64xf32>
    %cst_26 = arith.constant 2.000000e-01 : f32
    %48 = vector.broadcast %cst_26 : f32 to vector<16x64xf32>
    %49 = arith.mulf %48, %45 : vector<16x64xf32>
    %50 = arith.select %47, %45, %49 : vector<16x64xi1>, vector<16x64xf32>
    %51 = arith.truncf %44 : vector<16x64xf32> to vector<16x64xbf16>
    %c0_27 = arith.constant 0 : index
    %c0_28 = arith.constant 0 : index
    %52 = vector.load %arg8[%c0_27, %c0_28] : memref<64x64xbf16, #tpu.memory_space<vmem>>, vector<64x64xbf16>
    %cst_29 = arith.constant dense<0.000000e+00> : vector<16x64xf32>
    %53 = tpu.matmul %51, %52, %cst_29 {dimension_numbers = #tpu.dot_dimension_numbers<[1], [0], [0], [1], [0, 0, 1, 1], [], []>} : vector<16x64xbf16>, vector<64x64xbf16>, vector<16x64xf32> -> vector<16x64xf32>
    %c0_30 = arith.constant 0 : index
    %c0_31 = arith.constant 0 : index
    %54 = vector.load %arg9[%c0_30, %c0_31] : memref<1x64xf32, #tpu.memory_space<vmem>>, vector<1x64xf32>
    %55 = vector.broadcast %54 : vector<1x64xf32> to vector<16x64xf32>
    %56 = arith.addf %53, %55 : vector<16x64xf32>
    %57 = arith.addf %50, %56 : vector<16x64xf32>
    %cst_32 = arith.constant 0.000000e+00 : f32
    %58 = vector.broadcast %cst_32 : f32 to vector<16x64xf32>
    %59 = arith.cmpf oge, %57, %58 : vector<16x64xf32>
    %cst_33 = arith.constant 2.000000e-01 : f32
    %60 = vector.broadcast %cst_33 : f32 to vector<16x64xf32>
    %61 = arith.mulf %60, %57 : vector<16x64xf32>
    %62 = arith.select %59, %57, %61 : vector<16x64xi1>, vector<16x64xf32>
    %63 = arith.truncf %62 : vector<16x64xf32> to vector<16x64xbf16>
    %c0_34 = arith.constant 0 : index
    %c0_35 = arith.constant 0 : index
    %64 = vector.load %arg10[%c0_34, %c0_35] : memref<192x128xbf16, #tpu.memory_space<vmem>>, vector<64x128xbf16>
    %cst_36 = arith.constant dense<0.000000e+00> : vector<16x128xf32>
    %65 = tpu.matmul %63, %64, %cst_36 {dimension_numbers = #tpu.dot_dimension_numbers<[1], [0], [0], [1], [0, 0, 1, 1], [], []>} : vector<16x64xbf16>, vector<64x128xbf16>, vector<16x128xf32> -> vector<16x128xf32>
    %c64_37 = arith.constant 64 : index
    %c0_38 = arith.constant 0 : index
    %66 = vector.load %arg10[%c64_37, %c0_38] : memref<192x128xbf16, #tpu.memory_space<vmem>>, vector<128x128xbf16>
    %cst_39 = arith.constant dense<0.000000e+00> : vector<16x128xf32>
    %67 = tpu.matmul %0, %66, %cst_39 {dimension_numbers = #tpu.dot_dimension_numbers<[1], [0], [0], [1], [0, 0, 1, 1], [], []>} : vector<16x128xbf16>, vector<128x128xbf16>, vector<16x128xf32> -> vector<16x128xf32>
    %68 = arith.addf %65, %67 : vector<16x128xf32>
    %c0_40 = arith.constant 0 : index
    %c0_41 = arith.constant 0 : index
    %69 = vector.load %arg11[%c0_40, %c0_41] : memref<1x128xf32, #tpu.memory_space<vmem>>, vector<1x128xf32>
    %70 = vector.broadcast %69 : vector<1x128xf32> to vector<16x128xf32>
    %71 = arith.addf %68, %70 : vector<16x128xf32>
    %72 = vector.extract_strided_slice %71 {offsets = [0, 0], sizes = [16, 64], strides = [1, 1]} : vector<16x128xf32> to vector<16x64xf32>
    %cst_42 = arith.constant 0.000000e+00 : f32
    %73 = vector.broadcast %cst_42 : f32 to vector<16x64xf32>
    %74 = arith.cmpf oge, %72, %73 : vector<16x64xf32>
    %cst_43 = arith.constant 2.000000e-01 : f32
    %75 = vector.broadcast %cst_43 : f32 to vector<16x64xf32>
    %76 = arith.mulf %75, %72 : vector<16x64xf32>
    %77 = arith.select %74, %72, %76 : vector<16x64xi1>, vector<16x64xf32>
    %78 = vector.extract_strided_slice %71 {offsets = [0, 64], sizes = [16, 64], strides = [1, 1]} : vector<16x128xf32> to vector<16x64xf32>
    %cst_44 = arith.constant 0.000000e+00 : f32
    %79 = vector.broadcast %cst_44 : f32 to vector<16x64xf32>
    %80 = arith.cmpf oge, %78, %79 : vector<16x64xf32>
    %cst_45 = arith.constant 2.000000e-01 : f32
    %81 = vector.broadcast %cst_45 : f32 to vector<16x64xf32>
    %82 = arith.mulf %81, %78 : vector<16x64xf32>
    %83 = arith.select %80, %78, %82 : vector<16x64xi1>, vector<16x64xf32>
    %84 = arith.truncf %77 : vector<16x64xf32> to vector<16x64xbf16>
    %c0_46 = arith.constant 0 : index
    %c0_47 = arith.constant 0 : index
    %85 = vector.load %arg12[%c0_46, %c0_47] : memref<64x64xbf16, #tpu.memory_space<vmem>>, vector<64x64xbf16>
    %cst_48 = arith.constant dense<0.000000e+00> : vector<16x64xf32>
    %86 = tpu.matmul %84, %85, %cst_48 {dimension_numbers = #tpu.dot_dimension_numbers<[1], [0], [0], [1], [0, 0, 1, 1], [], []>} : vector<16x64xbf16>, vector<64x64xbf16>, vector<16x64xf32> -> vector<16x64xf32>
    %c0_49 = arith.constant 0 : index
    %c0_50 = arith.constant 0 : index
    %87 = vector.load %arg13[%c0_49, %c0_50] : memref<1x64xf32, #tpu.memory_space<vmem>>, vector<1x64xf32>
    %88 = vector.broadcast %87 : vector<1x64xf32> to vector<16x64xf32>
    %89 = arith.addf %86, %88 : vector<16x64xf32>
    %90 = arith.addf %83, %89 : vector<16x64xf32>
    %cst_51 = arith.constant 0.000000e+00 : f32
    %91 = vector.broadcast %cst_51 : f32 to vector<16x64xf32>
    %92 = arith.cmpf oge, %90, %91 : vector<16x64xf32>
    %cst_52 = arith.constant 2.000000e-01 : f32
    %93 = vector.broadcast %cst_52 : f32 to vector<16x64xf32>
    %94 = arith.mulf %93, %90 : vector<16x64xf32>
    %95 = arith.select %92, %90, %94 : vector<16x64xi1>, vector<16x64xf32>
    %c0_53 = arith.constant 0 : index
    %c0_54 = arith.constant 0 : index
    %96 = vector.load %arg14[%c0_53, %c0_54] : memref<1x64xf32, #tpu.memory_space<vmem>>, vector<1x64xf32>
    %97 = vector.broadcast %96 : vector<1x64xf32> to vector<16x64xf32>
    %98 = arith.mulf %95, %97 : vector<16x64xf32>
    %cst_55 = arith.constant dense<0.000000e+00> : vector<16xf32>
    %99 = vector.multi_reduction <add>, %98, %cst_55 [1] : vector<16x64xf32> to vector<16xf32>
    %100 = vector.shape_cast %99 : vector<16xf32> to vector<16x1xf32>
    %c0_56 = arith.constant 0 : index
    %c0_57 = arith.constant 0 : index
    %101 = vector.load %arg15[%c0_56, %c0_57] : memref<1x1xf32, #tpu.memory_space<vmem>>, vector<1x1xf32>
    %102 = vector.broadcast %101 : vector<1x1xf32> to vector<16x1xf32>
    %103 = arith.addf %100, %102 : vector<16x1xf32>
    %104 = arith.negf %103 : vector<16x1xf32>
    %105 = math.exp %104 : vector<16x1xf32>
    %cst_58 = arith.constant 1.000000e+00 : f32
    %106 = vector.broadcast %cst_58 : f32 to vector<16x1xf32>
    %107 = arith.addf %106, %105 : vector<16x1xf32>
    %108 = arith.divf %106, %107 : vector<16x1xf32>
    %109 = vector.shape_cast %108 : vector<16x1xf32> to vector<16x1xf32>
    %110 = vector.broadcast %109 : vector<16x1xf32> to vector<16x128xf32>
    %c0_59 = arith.constant 0 : index
    %c0_60 = arith.constant 0 : index
    %111 = vector.load %arg16[%c0_59, %c0_60] : memref<16x128xf32, #tpu.memory_space<vmem>>, vector<16x128xf32>
    tpu.vector_store %arg16[%c0_59, %c0_60], %110 {strides = array<i32>} : memref<16x128xf32, #tpu.memory_space<vmem>>, vector<16x128xf32>,
    return
  }
  func.func @transform_0(%arg0: i32) -> (i32, i32) {
    %c0_i32 = arith.constant 0 : i32
    %c0_i32_0 = arith.constant 0 : i32
    return %arg0, %c0_i32 : i32, i32
  }
  func.func @transform_1(%arg0: i32) -> (i32, i32) {
    %c0_i32 = arith.constant 0 : i32
    %c0_i32_0 = arith.constant 0 : i32
    %c0_i32_1 = arith.constant 0 : i32
    return %c0_i32, %c0_i32_0 : i32, i32
  }
  func.func @transform_2(%arg0: i32) -> (i32, i32) {
    %c0_i32 = arith.constant 0 : i32
    %c0_i32_0 = arith.constant 0 : i32
    %c0_i32_1 = arith.constant 0 : i32
    return %c0_i32, %c0_i32_0 : i32, i32
  }
  func.func @transform_3(%arg0: i32) -> (i32, i32) {
    %c0_i32 = arith.constant 0 : i32
    %c0_i32_0 = arith.constant 0 : i32
    %c0_i32_1 = arith.constant 0 : i32
    return %c0_i32, %c0_i32_0 : i32, i32
  }
  func.func @transform_4(%arg0: i32) -> (i32, i32) {
    %c0_i32 = arith.constant 0 : i32
    %c0_i32_0 = arith.constant 0 : i32
    %c0_i32_1 = arith.constant 0 : i32
    return %c0_i32, %c0_i32_0 : i32, i32
  }
  func.func @transform_5(%arg0: i32) -> (i32, i32) {
    %c0_i32 = arith.constant 0 : i32
    %c0_i32_0 = arith.constant 0 : i32
    %c0_i32_1 = arith.constant 0 : i32
    return %c0_i32, %c0_i32_0 : i32, i32
  }
  func.func @transform_6(%arg0: i32) -> (i32, i32) {
    %c0_i32 = arith.constant 0 : i32
    %c0_i32_0 = arith.constant 0 : i32
    %c0_i32_1 = arith.constant 0 : i32
    return %c0_i32, %c0_i32_0 : i32, i32
  }
  func.func @transform_7(%arg0: i32) -> (i32, i32) {
    %c0_i32 = arith.constant 0 : i32
    %c0_i32_0 = arith.constant 0 : i32
    %c0_i32_1 = arith.constant 0 : i32
    return %c0_i32, %c0_i32_0 : i32, i32
  }
  func.func @transform_8(%arg0: i32) -> (i32, i32) {
    %c0_i32 = arith.constant 0 : i32
    %c0_i32_0 = arith.constant 0 : i32
    %c0_i32_1 = arith.constant 0 : i32
    return %c0_i32, %c0_i32_0 : i32, i32
  }
  func.func @transform_9(%arg0: i32) -> (i32, i32) {
    %c0_i32 = arith.constant 0 : i32
    %c0_i32_0 = arith.constant 0 : i32
    %c0_i32_1 = arith.constant 0 : i32
    return %c0_i32, %c0_i32_0 : i32, i32
  }
  func.func @transform_10(%arg0: i32) -> (i32, i32) {
    %c0_i32 = arith.constant 0 : i32
    %c0_i32_0 = arith.constant 0 : i32
    %c0_i32_1 = arith.constant 0 : i32
    return %c0_i32, %c0_i32_0 : i32, i32
  }
  func.func @transform_11(%arg0: i32) -> (i32, i32) {
    %c0_i32 = arith.constant 0 : i32
    %c0_i32_0 = arith.constant 0 : i32
    %c0_i32_1 = arith.constant 0 : i32
    return %c0_i32, %c0_i32_0 : i32, i32
  }
  func.func @transform_12(%arg0: i32) -> (i32, i32) {
    %c0_i32 = arith.constant 0 : i32
    %c0_i32_0 = arith.constant 0 : i32
    %c0_i32_1 = arith.constant 0 : i32
    return %c0_i32, %c0_i32_0 : i32, i32
  }
  func.func @transform_13(%arg0: i32) -> (i32, i32) {
    %c0_i32 = arith.constant 0 : i32
    %c0_i32_0 = arith.constant 0 : i32
    %c0_i32_1 = arith.constant 0 : i32
    return %c0_i32, %c0_i32_0 : i32, i32
  }
  func.func @transform_14(%arg0: i32) -> (i32, i32) {
    %c0_i32 = arith.constant 0 : i32
    %c0_i32_0 = arith.constant 0 : i32
    %c0_i32_1 = arith.constant 0 : i32
    return %c0_i32, %c0_i32_0 : i32, i32
  }
  func.func @transform_15(%arg0: i32) -> (i32, i32) {
    %c0_i32 = arith.constant 0 : i32
    %c0_i32_0 = arith.constant 0 : i32
    return %arg0, %c0_i32 : i32, i32
  }
}

module attributes {stable_mosaic.version = 11 : i64} {
  func.func @ffh_evaluator_kernel(%arg0: i32, %arg1: memref<16x128xbf16, #tpu.memory_space<vmem>>, %arg2: memref<128x128xbf16, #tpu.memory_space<vmem>>, %arg3: memref<1x128xf32, #tpu.memory_space<vmem>>, %arg4: memref<64x64xbf16, #tpu.memory_space<vmem>>, %arg5: memref<1x64xf32, #tpu.memory_space<vmem>>, %arg6: memref<192x128xbf16, #tpu.memory_space<vmem>>, %arg7: memref<1x128xf32, #tpu.memory_space<vmem>>, %arg8: memref<64x64xbf16, #tpu.memory_space<vmem>>, %arg9: memref<1x64xf32, #tpu.memory_space<vmem>>, %arg10: memref<192x128xbf16, #tpu.memory_space<vmem>>, %arg11: memref<1x128xf32, #tpu.memory_space<vmem>>, %arg12: memref<64x64xbf16, #tpu.memory_space<vmem>>, %arg13: memref<1x64xf32, #tpu.memory_space<vmem>>, %arg14: memref<1x64xf32, #tpu.memory_space<vmem>>, %arg15: memref<1x1xf32, #tpu.memory_space<vmem>>, %arg16: memref<16x128xf32, #tpu.memory_space<vmem>>) attributes {dimension_semantics = [#tpu.dimension_semantics<parallel>], iteration_bounds = array<i64: 1>, scalar_prefetch = 0 : i64, scratch_operands = 0 : i64, tpu.core_type = #tpu.core_type<tc>, window_params = [{transform_indices = @transform_0, window_bounds = array<i64: 16, 128>}, {pipeline_mode = #tpu.pipeline_mode<synchronous>, transform_indices = @transform_1, window_bounds = array<i64: 128, 128>}, {pipeline_mode = #tpu.pipeline_mode<synchronous>, transform_indices = @transform_2, window_bounds = array<i64: 1, 128>}, {pipeline_mode = #tpu.pipeline_mode<synchronous>, transform_indices = @transform_3, window_bounds = array<i64: 64, 64>}, {pipeline_mode = #tpu.pipeline_mode<synchronous>, transform_indices = @transform_4, window_bounds = array<i64: 1, 64>}, {pipeline_mode = #tpu.pipeline_mode<synchronous>, transform_indices = @transform_5, window_bounds = array<i64: 192, 128>}, {pipeline_mode = #tpu.pipeline_mode<synchronous>, transform_indices = @transform_6, window_bounds = array<i64: 1, 128>}, {pipeline_mode = #tpu.pipeline_mode<synchronous>, transform_indices = @transform_7, window_bounds = array<i64: 64, 64>}, {pipeline_mode = #tpu.pipeline_mode<synchronous>, transform_indices = @transform_8, window_bounds = array<i64: 1, 64>}, {pipeline_mode = #tpu.pipeline_mode<synchronous>, transform_indices = @transform_9, window_bounds = array<i64: 192, 128>}, {pipeline_mode = #tpu.pipeline_mode<synchronous>, transform_indices = @transform_10, window_bounds = array<i64: 1, 128>}, {pipeline_mode = #tpu.pipeline_mode<synchronous>, transform_indices = @transform_11, window_bounds = array<i64: 64, 64>}, {pipeline_mode = #tpu.pipeline_mode<synchronous>, transform_indices = @transform_12, window_bounds = array<i64: 1, 64>}, {pipeline_mode = #tpu.pipeline_mode<synchronous>, transform_indices = @transform_13, window_bounds = array<i64: 1, 64>}, {pipeline_mode = #tpu.pipeline_mode<synchronous>, transform_indices = @transform_14, window_bounds = array<i64: 1, 1>}, {transform_indices = @transform_15, window_bounds = array<i64: 16, 128>}]} {
    %c0 = arith.constant 0 : index
    %c0_0 = arith.constant 0 : index
    %0 = vector.load %arg1[%c0, %c0_0] : memref<16x128xbf16, #tpu.memory_space<vmem>>, vector<16x128xbf16>
    %c0_1 = arith.constant 0 : index
    %c0_2 = arith.constant 0 : index
    %1 = vector.load %arg2[%c0_1, %c0_2] : memref<128x128xbf16, #tpu.memory_space<vmem>>, vector<128x128xbf16>
    %cst = arith.constant dense<0.000000e+00> : vector<16x128xf32>
    %2 = tpu.matmul %0, %1, %cst {dimension_numbers = #tpu.dot_dimension_numbers<[1], [0], [0], [1], [0, 0, 1, 1], [], []>} : vector<16x128xbf16>, vector<128x128xbf16>, vector<16x128xf32> -> vector<16x128xf32>
    %c0_3 = arith.constant 0 : index
    %c0_4 = arith.constant 0 : index
    %3 = vector.load %arg3[%c0_3, %c0_4] : memref<1x128xf32, #tpu.memory_space<vmem>>, vector<1x128xf32>
    %4 = vector.broadcast %3 : vector<1x128xf32> to vector<16x128xf32>
    %5 = arith.addf %2, %4 : vector<16x128xf32>
    %6 = vector.extract_strided_slice %5 {offsets = [0, 0], sizes = [16, 64], strides = [1, 1]} : vector<16x128xf32> to vector<16x64xf32>
    %cst_5 = arith.constant 0.000000e+00 : f32
    %7 = vector.broadcast %cst_5 : f32 to vector<16x64xf32>
    %8 = arith.cmpf oge, %6, %7 : vector<16x64xf32>
    %cst_6 = arith.constant 2.000000e-01 : f32
    %9 = vector.broadcast %cst_6 : f32 to vector<16x64xf32>
    %10 = arith.mulf %9, %6 : vector<16x64xf32>
    %11 = arith.select %8, %6, %10 : vector<16x64xi1>, vector<16x64xf32>
    %12 = vector.extract_strided_slice %5 {offsets = [0, 64], sizes = [16, 64], strides = [1, 1]} : vector<16x128xf32> to vector<16x64xf32>
    %cst_7 = arith.constant 0.000000e+00 : f32
    %13 = vector.broadcast %cst_7 : f32 to vector<16x64xf32>
    %14 = arith.cmpf oge, %12, %13 : vector<16x64xf32>
    %cst_8 = arith.constant 2.000000e-01 : f32
    %15 = vector.broadcast %cst_8 : f32 to vector<16x64xf32>
    %16 = arith.mulf %15, %12 : vector<16x64xf32>
    %17 = arith.select %14, %12, %16 : vector<16x64xi1>, vector<16x64xf32>
    %18 = arith.truncf %11 : vector<16x64xf32> to vector<16x64xbf16>
    %c0_9 = arith.constant 0 : index
    %c0_10 = arith.constant 0 : index
    %19 = vector.load %arg4[%c0_9, %c0_10] : memref<64x64xbf16, #tpu.memory_space<vmem>>, vector<64x64xbf16>
    %cst_11 = arith.constant dense<0.000000e+00> : vector<16x64xf32>
    %20 = tpu.matmul %18, %19, %cst_11 {dimension_numbers = #tpu.dot_dimension_numbers<[1], [0], [0], [1], [0, 0, 1, 1], [], []>} : vector<16x64xbf16>, vector<64x64xbf16>, vector<16x64xf32> -> vector<16x64xf32>
    %c0_12 = arith.constant 0 : index
    %c0_13 = arith.constant 0 : index
    %21 = vector.load %arg5[%c0_12, %c0_13] : memref<1x64xf32, #tpu.memory_space<vmem>>, vector<1x64xf32>
    %22 = vector.broadcast %21 : vector<1x64xf32> to vector<16x64xf32>
    %23 = arith.addf %20, %22 : vector<16x64xf32>
    %24 = arith.addf %17, %23 : vector<16x64xf32>
    %cst_14 = arith.constant 0.000000e+00 : f32
    %25 = vector.broadcast %cst_14 : f32 to vector<16x64xf32>
    %26 = arith.cmpf oge, %24, %25 : vector<16x64xf32>
    %cst_15 = arith.constant 2.000000e-01 : f32
    %27 = vector.broadcast %cst_15 : f32 to vector<16x64xf32>
    %28 = arith.mulf %27, %24 : vector<16x64xf32>
    %29 = arith.select %26, %24, %28 : vector<16x64xi1>, vector<16x64xf32>
    %30 = arith.truncf %29 : vector<16x64xf32> to vector<16x64xbf16>
    %c0_16 = arith.constant 0 : index
    %c0_17 = arith.constant 0 : index
    %31 = vector.load %arg6[%c0_16, %c0_17] : memref<192x128xbf16, #tpu.memory_space<vmem>>, vector<64x128xbf16>
    %cst_18 = arith.constant dense<0.000000e+00> : vector<16x128xf32>
    %32 = tpu.matmul %30, %31, %cst_18 {dimension_numbers = #tpu.dot_dimension_numbers<[1], [0], [0], [1], [0, 0, 1, 1], [], []>} : vector<16x64xbf16>, vector<64x128xbf16>, vector<16x128xf32> -> vector<16x128xf32>
    %c64 = arith.constant 64 : index
    %c0_19 = arith.constant 0 : index
    %33 = vector.load %arg6[%c64, %c0_19] : memref<192x128xbf16, #tpu.memory_space<vmem>>, vector<128x128xbf16>
    %cst_20 = arith.constant dense<0.000000e+00> : vector<16x128xf32>
    %34 = tpu.matmul %0, %33, %cst_20 {dimension_numbers = #tpu.dot_dimension_numbers<[1], [0], [0], [1], [0, 0, 1, 1], [], []>} : vector<16x128xbf16>, vector<128x128xbf16>, vector<16x128xf32> -> vector<16x128xf32>
    %35 = arith.addf %32, %34 : vector<16x128xf32>
    %c0_21 = arith.constant 0 : index
    %c0_22 = arith.constant 0 : index
    %36 = vector.load %arg7[%c0_21, %c0_22] : memref<1x128xf32, #tpu.memory_space<vmem>>, vector<1x128xf32>
    %37 = vector.broadcast %36 : vector<1x128xf32> to vector<16x128xf32>
    %38 = arith.addf %35, %37 : vector<16x128xf32>
    %39 = vector.extract_strided_slice %38 {offsets = [0, 0], sizes = [16, 64], strides = [1, 1]} : vector<16x128xf32> to vector<16x64xf32>
    %cst_23 = arith.constant 0.000000e+00 : f32
    %40 = vector.broadcast %cst_23 : f32 to vector<16x64xf32>
    %41 = arith.cmpf oge, %39, %40 : vector<16x64xf32>
    %cst_24 = arith.constant 2.000000e-01 : f32
    %42 = vector.broadcast %cst_24 : f32 to vector<16x64xf32>
    %43 = arith.mulf %42, %39 : vector<16x64xf32>
    %44 = arith.select %41, %39, %43 : vector<16x64xi1>, vector<16x64xf32>
    %45 = vector.extract_strided_slice %38 {offsets = [0, 64], sizes = [16, 64], strides = [1, 1]} : vector<16x128xf32> to vector<16x64xf32>
    %cst_25 = arith.constant 0.000000e+00 : f32
    %46 = vector.broadcast %cst_25 : f32 to vector<16x64xf32>
    %47 = arith.cmpf oge, %45, %46 : vector<16x64xf32>
    %cst_26 = arith.constant 2.000000e-01 : f32
    %48 = vector.broadcast %cst_26 : f32 to vector<16x64xf32>
    %49 = arith.mulf %48, %45 : vector<16x64xf32>
    %50 = arith.select %47, %45, %49 : vector<16x64xi1>, vector<16x64xf32>
    %51 = arith.truncf %44 : vector<16x64xf32> to vector<16x64xbf16>
    %c0_27 = arith.constant 0 : index
    %c0_28 = arith.constant 0 : index
    %52 = vector.load %arg8[%c0_27, %c0_28] : memref<64x64xbf16, #tpu.memory_space<vmem>>, vector<64x64xbf16>
    %cst_29 = arith.constant dense<0.000000e+00> : vector<16x64xf32>
    %53 = tpu.matmul %51, %52, %cst_29 {dimension_numbers = #tpu.dot_dimension_numbers<[1], [0], [0], [1], [0, 0, 1, 1], [], []>} : vector<16x64xbf16>, vector<64x64xbf16>, vector<16x64xf32> -> vector<16x64xf32>
    %c0_30 = arith.constant 0 : index
    %c0_31 = arith.constant 0 : index
    %54 = vector.load %arg9[%c0_30, %c0_31] : memref<1x64xf32, #tpu.memory_space<vmem>>, vector<1x64xf32>
    %55 = vector.broadcast %54 : vector<1x64xf32> to vector<16x64xf32>
    %56 = arith.addf %53, %55 : vector<16x64xf32>
    %57 = arith.addf %50, %56 : vector<16x64xf32>
    %cst_32 = arith.constant 0.000000e+00 : f32
    %58 = vector.broadcast %cst_32 : f32 to vector<16x64xf32>
    %59 = arith.cmpf oge, %57, %58 : vector<16x64xf32>
    %cst_33 = arith.constant 2.000000e-01 : f32
    %60 = vector.broadcast %cst_33 : f32 to vector<16x64xf32>
    %61 = arith.mulf %60, %57 : vector<16x64xf32>
    %62 = arith.select %59, %57, %61 : vector<16x64xi1>, vector<16x64xf32>
    %63 = arith.truncf %62 : vector<16x64xf32> to vector<16x64xbf16>
    %c0_34 = arith.constant 0 : index
    %c0_35 = arith.constant 0 : index
    %64 = vector.load %arg10[%c0_34, %c0_35] : memref<192x128xbf16, #tpu.memory_space<vmem>>, vector<64x128xbf16>
    %cst_36 = arith.constant dense<0.000000e+00> : vector<16x128xf32>
    %65 = tpu.matmul %63, %64, %cst_36 {dimension_numbers = #tpu.dot_dimension_numbers<[1], [0], [0], [1], [0, 0, 1, 1], [], []>} : vector<16x64xbf16>, vector<64x128xbf16>, vector<16x128xf32> -> vector<16x128xf32>
    %c64_37 = arith.constant 64 : index
    %c0_38 = arith.constant 0 : index
    %66 = vector.load %arg10[%c64_37, %c0_38] : memref<192x128xbf16, #tpu.memory_space<vmem>>, vector<128x128xbf16>
    %cst_39 = arith.constant dense<0.000000e+00> : vector<16x128xf32>
    %67 = tpu.matmul %0, %66, %cst_39 {dimension_numbers = #tpu.dot_dimension_numbers<[1], [0], [0], [1], [0, 0, 1, 1], [], []>} : vector<16x128xbf16>, vector<128x128xbf16>, vector<16x128xf32> -> vector<16x128xf32>
    %68 = arith.addf %65, %67 : vector<16x128xf32>
    %c0_40 = arith.constant 0 : index
    %c0_41 = arith.constant 0 : index
    %69 = vector.load %arg11[%c0_40, %c0_41] : memref<1x128xf32, #tpu.memory_space<vmem>>, vector<1x128xf32>
    %70 = vector.broadcast %69 : vector<1x128xf32> to vector<16x128xf32>
    %71 = arith.addf %68, %70 : vector<16x128xf32>
    %72 = vector.extract_strided_slice %71 {offsets = [0, 0], sizes = [16, 64], strides = [1, 1]} : vector<16x128xf32> to vector<16x64xf32>
    %cst_42 = arith.constant 0.000000e+00 : f32
    %73 = vector.broadcast %cst_42 : f32 to vector<16x64xf32>
    %74 = arith.cmpf oge, %72, %73 : vector<16x64xf32>
    %cst_43 = arith.constant 2.000000e-01 : f32
    %75 = vector.broadcast %cst_43 : f32 to vector<16x64xf32>
    %76 = arith.mulf %75, %72 : vector<16x64xf32>
    %77 = arith.select %74, %72, %76 : vector<16x64xi1>, vector<16x64xf32>
    %78 = vector.extract_strided_slice %71 {offsets = [0, 64], sizes = [16, 64], strides = [1, 1]} : vector<16x128xf32> to vector<16x64xf32>
    %cst_44 = arith.constant 0.000000e+00 : f32
    %79 = vector.broadcast %cst_44 : f32 to vector<16x64xf32>
    %80 = arith.cmpf oge, %78, %79 : vector<16x64xf32>
    %cst_45 = arith.constant 2.000000e-01 : f32
    %81 = vector.broadcast %cst_45 : f32 to vector<16x64xf32>
    %82 = arith.mulf %81, %78 : vector<16x64xf32>
    %83 = arith.select %80, %78, %82 : vector<16x64xi1>, vector<16x64xf32>
    %84 = arith.truncf %77 : vector<16x64xf32> to vector<16x64xbf16>
    %c0_46 = arith.constant 0 : index
    %c0_47 = arith.constant 0 : index
    %85 = vector.load %arg12[%c0_46, %c0_47] : memref<64x64xbf16, #tpu.memory_space<vmem>>, vector<64x64xbf16>
    %cst_48 = arith.constant dense<0.000000e+00> : vector<16x64xf32>
    %86 = tpu.matmul %84, %85, %cst_48 {dimension_numbers = #tpu.dot_dimension_numbers<[1], [0], [0], [1], [0, 0, 1, 1], [], []>} : vector<16x64xbf16>, vector<64x64xbf16>, vector<16x64xf32> -> vector<16x64xf32>
    %c0_49 = arith.constant 0 : index
    %c0_50 = arith.constant 0 : index
    %87 = vector.load %arg13[%c0_49, %c0_50] : memref<1x64xf32, #tpu.memory_space<vmem>>, vector<1x64xf32>
    %88 = vector.broadcast %87 : vector<1x64xf32> to vector<16x64xf32>
    %89 = arith.addf %86, %88 : vector<16x64xf32>
    %90 = arith.addf %83, %89 : vector<16x64xf32>
    %cst_51 = arith.constant 0.000000e+00 : f32
    %91 = vector.broadcast %cst_51 : f32 to vector<16x64xf32>
    %92 = arith.cmpf oge, %90, %91 : vector<16x64xf32>
    %cst_52 = arith.constant 2.000000e-01 : f32
    %93 = vector.broadcast %cst_52 : f32 to vector<16x64xf32>
    %94 = arith.mulf %93, %90 : vector<16x64xf32>
    %95 = arith.select %92, %90, %94 : vector<16x64xi1>, vector<16x64xf32>
    %c0_53 = arith.constant 0 : index
    %c0_54 = arith.constant 0 : index
    %96 = vector.load %arg14[%c0_53, %c0_54] : memref<1x64xf32, #tpu.memory_space<vmem>>, vector<1x64xf32>
    %97 = vector.broadcast %96 : vector<1x64xf32> to vector<16x64xf32>
    %98 = arith.mulf %95, %97 : vector<16x64xf32>
    %cst_55 = arith.constant dense<0.000000e+00> : vector<16xf32>
    %99 = vector.multi_reduction <add>, %98, %cst_55 [1] : vector<16x64xf32> to vector<16xf32>
    %100 = vector.shape_cast %99 : vector<16xf32> to vector<16x1xf32>
    %c0_56 = arith.constant 0 : index
    %c0_57 = arith.constant 0 : index
    %101 = vector.load %arg15[%c0_56, %c0_57] : memref<1x1xf32, #tpu.memory_space<vmem>>, vector<1x1xf32>
    %102 = vector.broadcast %101 : vector<1x1xf32> to vector<16x1xf32>
    %103 = arith.addf %100, %102 : vector<16x1xf32>
    %104 = arith.negf %103 : vector<16x1xf32>
    %105 = math.exp %104 : vector<16x1xf32>
    %cst_58 = arith.constant 1.000000e+00 : f32
    %106 = vector.broadcast %cst_58 : f32 to vector<16x1xf32>
    %107 = arith.addf %106, %105 : vector<16x1xf32>
    %108 = arith.divf %106, %107 : vector<16x1xf32>
    %109 = vector.shape_cast %108 : vector<16x1xf32> to vector<16x1xf32>
    %110 = vector.broadcast %109 : vector<16x1xf32> to vector<16x128xf32>
    %c0_59 = arith.constant 0 : index
    %c0_60 = arith.constant 0 : index
    %111 = vector.load %arg16[%c0_59, %c0_60] : memref<16x128xf32, #tpu.memory_space<vmem>>, vector<16x128xf32>
    tpu.vector_store %arg16[%c0_59, %c0_60], %110 {strides = array<i32>} : memref<16x128xf32, #tpu.memory_space<vmem>>, vector<16x128xf32>,
    return
  }
  func.func @transform_0(%arg0: i32) -> (i32, i32) {
    %c0_i32 = arith.constant 0 : i32
    %c0_i32_0 = arith.constant 0 : i32
    return %arg0, %c0_i32 : i32, i32
  }
  func.func @transform_1(%arg0: i32) -> (i32, i32) {
    %c0_i32 = arith.constant 0 : i32
    %c0_i32_0 = arith.constant 0 : i32
    %c0_i32_1 = arith.constant 0 : i32
    return %c0_i32, %c0_i32_0 : i32, i32
  }
  func.func @transform_2(%arg0: i32) -> (i32, i32) {
    %c0_i32 = arith.constant 0 : i32
    %c0_i32_0 = arith.constant 0 : i32
    %c0_i32_1 = arith.constant 0 : i32
    return %c0_i32, %c0_i32_0 : i32, i32
  }
  func.func @transform_3(%arg0: i32) -> (i32, i32) {
    %c0_i32 = arith.constant 0 : i32
    %c0_i32_0 = arith.constant 0 : i32
    %c0_i32_1 = arith.constant 0 : i32
    return %c0_i32, %c0_i32_0 : i32, i32
  }
  func.func @transform_4(%arg0: i32) -> (i32, i32) {
    %c0_i32 = arith.constant 0 : i32
    %c0_i32_0 = arith.constant 0 : i32
    %c0_i32_1 = arith.constant 0 : i32
    return %c0_i32, %c0_i32_0 : i32, i32
  }
  func.func @transform_5(%arg0: i32) -> (i32, i32) {
    %c0_i32 = arith.constant 0 : i32
    %c0_i32_0 = arith.constant 0 : i32
    %c0_i32_1 = arith.constant 0 : i32
    return %c0_i32, %c0_i32_0 : i32, i32
  }
  func.func @transform_6(%arg0: i32) -> (i32, i32) {
    %c0_i32 = arith.constant 0 : i32
    %c0_i32_0 = arith.constant 0 : i32
    %c0_i32_1 = arith.constant 0 : i32
    return %c0_i32, %c0_i32_0 : i32, i32
  }
  func.func @transform_7(%arg0: i32) -> (i32, i32) {
    %c0_i32 = arith.constant 0 : i32
    %c0_i32_0 = arith.constant 0 : i32
    %c0_i32_1 = arith.constant 0 : i32
    return %c0_i32, %c0_i32_0 : i32, i32
  }
  func.func @transform_8(%arg0: i32) -> (i32, i32) {
    %c0_i32 = arith.constant 0 : i32
    %c0_i32_0 = arith.constant 0 : i32
    %c0_i32_1 = arith.constant 0 : i32
    return %c0_i32, %c0_i32_0 : i32, i32
  }
  func.func @transform_9(%arg0: i32) -> (i32, i32) {
    %c0_i32 = arith.constant 0 : i32
    %c0_i32_0 = arith.constant 0 : i32
    %c0_i32_1 = arith.constant 0 : i32
    return %c0_i32, %c0_i32_0 : i32, i32
  }
  func.func @transform_10(%arg0: i32) -> (i32, i32) {
    %c0_i32 = arith.constant 0 : i32
    %c0_i32_0 = arith.constant 0 : i32
    %c0_i32_1 = arith.constant 0 : i32
    return %c0_i32, %c0_i32_0 : i32, i32
  }
  func.func @transform_11(%arg0: i32) -> (i32, i32) {
    %c0_i32 = arith.constant 0 : i32
    %c0_i32_0 = arith.constant 0 : i32
    %c0_i32_1 = arith.constant 0 : i32
    return %c0_i32, %c0_i32_0 : i32, i32
  }
  func.func @transform_12(%arg0: i32) -> (i32, i32) {
    %c0_i32 = arith.constant 0 : i32
    %c0_i32_0 = arith.constant 0 : i32
    %c0_i32_1 = arith.constant 0 : i32
    return %c0_i32, %c0_i32_0 : i32, i32
  }
  func.func @transform_13(%arg0: i32) -> (i32, i32) {
    %c0_i32 = arith.constant 0 : i32
    %c0_i32_0 = arith.constant 0 : i32
    %c0_i32_1 = arith.constant 0 : i32
    return %c0_i32, %c0_i32_0 : i32, i32
  }
  func.func @transform_14(%arg0: i32) -> (i32, i32) {
    %c0_i32 = arith.constant 0 : i32
    %c0_i32_0 = arith.constant 0 : i32
    %c0_i32_1 = arith.constant 0 : i32
    return %c0_i32, %c0_i32_0 : i32, i32
  }
  func.func @transform_15(%arg0: i32) -> (i32, i32) {
    %c0_i32 = arith.constant 0 : i32
    %c0_i32_0 = arith.constant 0 : i32
    return %arg0, %c0_i32 : i32, i32
  }
}

</mosaic_0001>

<bundles_post_ra>
// kernel: tpu_custom_call.1
= control target key start
LH: loop header
LB: loop body
LE: loop exit
PB: predicated region body
PF: predicated region fallthrough
CT: control target
= control target key end

     0   :  { %s1773_s0 = inlined_call_operand.hbm [shape: bf16[16,128], index: 0, kind: input, shape index: {}]   ;;  %s1774_s1 = inlined_call_operand.hbm [shape: bf16[128,128], index: 1, kind: input, shape index: {}]   ;;  %s1775_s2 = inlined_call_operand.vmem [shape: f32[1,128], index: 2, kind: input, shape index: {}]   ;;  %s1776_s3 = inlined_call_operand.hbm [shape: bf16[64,64], index: 3, kind: input, shape index: {}]   ;;  %s1777_s4 = inlined_call_operand.vmem [shape: f32[1,64], index: 4, kind: input, shape index: {}]   ;;  %s1778_s5 = inlined_call_operand.hbm [shape: bf16[192,128], index: 5, kind: input, shape index: {}]   ;;  %s1779_s6 = inlined_call_operand.vmem [shape: f32[1,128], index: 6, kind: input, shape index: {}]   ;;  %s1780_s7 = inlined_call_operand.hbm [shape: bf16[64,64], index: 7, kind: input, shape index: {}]   ;;  %s1781_s8 = inlined_call_operand.vmem [shape: f32[1,64], index: 8, kind: input, shape index: {}]   ;;  %s1782_s9 = inlined_call_operand.hbm [shape: bf16[192,128], index: 9, kind: input, shape index: {}]   ;;  %s1783_s10 = inlined_call_operand.vmem [shape: f32[1,128], index: 10, kind: input, shape index: {}]   ;;  %s1784_s11 = inlined_call_operand.hbm [shape: bf16[64,64], index: 11, kind: input, shape index: {}]   ;;  %s1785_s12 = inlined_call_operand.vmem [shape: f32[1,64], index: 12, kind: input, shape index: {}]   ;;  %s1786_s13 = inlined_call_operand.vmem [shape: f32[1,64], index: 13, kind: input, shape index: {}]   ;;  %s1787_s14 = inlined_call_operand.<no memory space> [shape: f32[1,1], index: 14, kind: input, shape index: {}]   ;;  %s1788_s15 = inlined_call_operand.hbm [shape: f32[16,128], index: 15, kind: output, shape index: {}]  }
   0x1   :  { %v20_v0 = vstv %s1787_s14 }
   0x2   :  { %21 = vst [vmem:[#allocation2] sm:$0x1] %v20_v0 }
   0x3   :  { %22 = vsyncpa [#allocation4], 0 }
   0x4   :  { %23 = vsyncpa [#allocation7], 0 }
   0x5   :  { %24 = vsyncpa [#allocation10], 0 }
   0x6   :  { %25 = vsyncpa [#allocation13], 0 }
   0x7   :  { %26 = vsyncpa [#allocation5], 0  ;;  %s1526_s20 = smov [#allocation6]   ;;  %s1527_s22 = smov [#allocation9]  }
   0x8   :  { %s44_s21 = sshll.u32 %s1526_s20, 4  ;;  %s72_s23 = sshll.u32 %s1527_s22, 4  ;;  %s45_s21 = int_to_ptr.vmem [resolvable:$true] %s44_s21  ;;  %s73_s23 = int_to_ptr.vmem [resolvable:$true] %s72_s23 }
   0x9   :  { %s1364_s24 = scalar_lea.vmem %s45_s21, 1024  ;;  %p1369_p1 = scmp.lt.s32.totalorder %s45_s21, %s45_s21 }
   0xa   :  { %p1365_p0 = scmp.ne.s32.totalorder %s45_s21, %s1364_s24  ;;  %p1370_p2 = scmp.lt.s32.totalorder %s1364_s24, %s1364_s24 }
   0xc   :  { %p1371_p3 = por %p1370_p2, %p1369_p1 }
   0xe   :  { %p1372_p4 = pnand %p1371_p3, %p1365_p0 }
  0x10   :  { %1375 = shalt.err (!%p1372_p4)
}
  0x11   :  { %s1528_s14 = smov 64   ;;  %s1529_s25 = smov 4  }
  0x12   :  { %50 = dma.hbm_to_vmem [thread:$0]  %s1774_s1, 1024, %s45_s21, [#allocation7], %s1528_s14, %s1528_s14, %s1529_s25  }
  0x13   :  { %s1384_s28 = scalar_lea.vmem %s73_s23, 1536  ;;  %p1389_p6 = scmp.lt.s32.totalorder %s73_s23, %s73_s23 }
  0x14   :  { %p1385_p5 = scmp.ne.s32.totalorder %s73_s23, %s1384_s28  ;;  %p1390_p7 = scmp.lt.s32.totalorder %s1384_s28, %s1384_s28 }
  0x16   :  { %p1391_p8 = por %p1390_p7, %p1389_p6 }
  0x18   :  { %p1392_p9 = pnand %p1391_p8, %p1385_p5 }
  0x1a   :  { %1395 = shalt.err (!%p1392_p9)
}
  0x1b   :  { %78 = dma.hbm_to_vmem [thread:$0]  %s1778_s5, 1536, %s73_s23, [#allocation10], %s1528_s14, %s1528_s14, %s1529_s25  }
  0x1c   :  { %s1530_s16 = smov [#allocation12]   ;;  %s1531_s18 = smov [#allocation3]  }
  0x1d   :  { %s100_s17 = sshll.u32 %s1530_s16, 4  ;;  %s32_s19 = sshll.u32 %s1531_s18, 4  ;;  %s101_s17 = int_to_ptr.vmem [resolvable:$true] %s100_s17  ;;  %s33_s19 = int_to_ptr.vmem [resolvable:$true] %s32_s19 }
  0x1e   :  { %s1404_s1 = scalar_lea.vmem %s101_s17, 1536  ;;  %p1409_p11 = scmp.lt.s32.totalorder %s101_s17, %s101_s17 }
  0x1f   :  { %p1405_p10 = scmp.ne.s32.totalorder %s101_s17, %s1404_s1  ;;  %p1410_p12 = scmp.lt.s32.totalorder %s1404_s1, %s1404_s1 }
  0x21   :  { %p1411_p13 = por %p1410_p12, %p1409_p11 }
  0x23   :  { %p1412_p0 = pnand %p1411_p13, %p1405_p10 }
  0x25   :  { %1415 = shalt.err (!%p1412_p0)
}
  0x26   :  { %106 = dma.hbm_to_vmem [thread:$0]  %s1782_s9, 1536, %s101_s17, [#allocation13], %s1528_s14, %s1528_s14, %s1529_s25  }
  0x27   :  { %s1424_s5 = scalar_lea.vmem %s33_s19, 128  ;;  %p1429_p2 = scmp.lt.s32.totalorder %s33_s19, %s33_s19 }
  0x28   :  { %p1425_p1 = scmp.ne.s32.totalorder %s33_s19, %s1424_s5  ;;  %p1430_p3 = scmp.lt.s32.totalorder %s1424_s5, %s1424_s5 }
  0x2a   :  { %p1431_p4 = por %p1430_p3, %p1429_p2 }
  0x2c   :  { %p1432_p5 = pnand %p1431_p4, %p1425_p1 }
  0x2e   :  { %1435 = shalt.err (!%p1432_p5)
}
  0x2f   :  { %38 = dma.hbm_to_vmem [thread:$0]  %s1773_s0, 128, %s33_s19, [#allocation4], %s1528_s14, %s1528_s14, %s1529_s25  }
  0x30   :  { %s1532_s24 = smov [#allocation8]   ;;  %s1533_s27 = smov [#allocation11]  }
  0x31   :  { %s58_s26 = sshll.u32 %s1532_s24, 4  ;;  %s86_s28 = sshll.u32 %s1533_s27, 4  ;;  %s59_s26 = int_to_ptr.vmem [resolvable:$true] %s58_s26  ;;  %s87_s28 = int_to_ptr.vmem [resolvable:$true] %s86_s28 }
  0x32   :  { %s1444_s9 = scalar_lea.vmem %s59_s26, 512  ;;  %p1449_p7 = scmp.lt.s32.totalorder %s59_s26, %s59_s26 }
  0x33   :  { %p1445_p6 = scmp.ne.s32.totalorder %s59_s26, %s1444_s9  ;;  %p1450_p8 = scmp.lt.s32.totalorder %s1444_s9, %s1444_s9 }
  0x35   :  { %p1451_p9 = por %p1450_p8, %p1449_p7 }
  0x37   :  { %p1452_p10 = pnand %p1451_p9, %p1445_p6 }
  0x39   :  { %1455 = shalt.err (!%p1452_p10)
}
  0x3a   :  { %64 = dma.hbm_to_vmem [thread:$0]  %s1776_s3, 512, %s59_s26, [#allocation7], %s1528_s14, %s1528_s14, %s1529_s25  }
  0x3b   :  { %s1464_s0 = scalar_lea.vmem %s87_s28, 512  ;;  %p1469_p12 = scmp.lt.s32.totalorder %s87_s28, %s87_s28 }
  0x3c   :  { %p1465_p11 = scmp.ne.s32.totalorder %s87_s28, %s1464_s0  ;;  %p1470_p13 = scmp.lt.s32.totalorder %s1464_s0, %s1464_s0 }
  0x3e   :  { %p1471_p0 = por %p1470_p13, %p1469_p12 }
  0x40   :  { %p1472_p1 = pnand %p1471_p0, %p1465_p11 }
  0x42   :  { %1475 = shalt.err (!%p1472_p1)
}
  0x43   :  { %92 = dma.hbm_to_vmem [thread:$0]  %s1780_s7, 512, %s87_s28, [#allocation10], %s1528_s14, %s1528_s14, %s1529_s25  }
  0x44   :  { %s1534_s18 = smov [#allocation14]  }
  0x45   :  { %s114_s19 = sshll.u32 %s1534_s18, 4  ;;  %s115_s19 = int_to_ptr.vmem [resolvable:$true] %s114_s19 }
  0x46   :  { %s1484_s1 = scalar_lea.vmem %s115_s19, 512  ;;  %p1489_p3 = scmp.lt.s32.totalorder %s115_s19, %s115_s19 }
  0x47   :  { %p1485_p2 = scmp.ne.s32.totalorder %s115_s19, %s1484_s1  ;;  %p1490_p4 = scmp.lt.s32.totalorder %s1484_s1, %s1484_s1 }
  0x49   :  { %p1491_p5 = por %p1490_p4, %p1489_p3 }
  0x4b   :  { %p1492_p6 = pnand %p1491_p5, %p1485_p2 }
  0x4d   :  { %1495 = shalt.err (!%p1492_p6)
}
  0x4e   :  { %120 = dma.hbm_to_vmem [thread:$0]  %s1784_s11, 512, %s115_s19, [#allocation13], %s1528_s14, %s1528_s14, %s1529_s25  }
  0x4f   :  { %1516 = dma.done.wait [#allocation4], 128  }
  0x50   :  { %1517 = vsyncadd [#allocation4], 4294967168 }
  0x51   :  { %1518 = dma.done.wait [#allocation7], 1536  }
  0x52   :  { %1519 = vsyncadd [#allocation7], 4294965760 }
  0x53   :  { %1520 = dma.done.wait [#allocation10], 2048  }
  0x54   :  { %1521 = vsyncadd [#allocation10], 4294965248 }
  0x55   :  { %1522 = dma.done.wait [#allocation13], 2048  }
  0x56   :  { %1523 = vsyncadd [#allocation13], 4294965248  ;;  %v1535_v1 = vmov 0.0   ;;  %vm1536_vm0 = vmmov 0   ;;  %v1303_v2 = vld [vmem:[#allocation6 + $0x38] sm:$0xff]   ;;  %v1304_v3 = vld [vmem:[#allocation6 + $0x30] sm:$0xff]  }
  0x57   :  { %1166 = vmatprep.subr.bf16.mxu0 %v1535_v1  ;;  %1182 = vmatprep.mubr.msk.bf16.mxu0 %vm1536_vm0, %v1535_v1  ;;  %v1305_v4 = vld [vmem:[#allocation6 + $0x28] sm:$0xff]   ;;  %v1312_v5 = vld [vmem:[#allocation8 + $0x18] sm:$0xff]   ;;  %v1306_v6 = vld [vmem:[#allocation6 + $0x20] sm:$0xff]   ;;  %vm315_vm3 = vcmask 523264  }
  0x58   :  { %1186 = vmatprep.subr.bf16.mxu1 %v1535_v1  ;;  %1194 = vmatprep.mubr.msk.bf16.mxu1 %vm1536_vm0, %v1535_v1  ;;  %v1307_v7 = vld [vmem:[#allocation6 + $0x18] sm:$0xff]   ;;  %v1308_v8 = vld [vmem:[#allocation6 + $0x10] sm:$0xff]   ;;  %v1309_v9 = vld [vmem:[#allocation6 + $0x8] sm:$0xff]  }
  0x59   :  { %1167 = vmatpush3.bf16.msra.mxu0 %v1303_v2  ;;  %1187 = vmatpush3.bf16.msra.mxu1 %v1312_v5  ;;  %v1310_v10 = vld [vmem:[#allocation6] sm:$0xff]   ;;  %v1680_v11 = vld [vmem:[#allocation3] sm:$0xff]   ;;  %v1313_v12 = vld [vmem:[#allocation8 + $0x10] sm:$0xff]  }
  0x5a   :  { %1168 = vmatprep.subr.bf16.mxu0 %v1535_v1  ;;  %1188 = vmatprep.subr.bf16.mxu1 %v1535_v1  ;;  %v1314_v13 = vld [vmem:[#allocation8 + $0x8] sm:$0xff]   ;;  %v1315_v14 = vld [vmem:[#allocation8] sm:$0xff]   ;;  %v1054_v15 = vld [vmem:[%s1775_s2] ss:$0 sm:$0xff] }
  0x5b   :  { %v1064_v27 = vld [vmem:[%s1777_s4] ss:$0 sm:$0xff]  ;;  %v1316_v30 = vld [vmem:[#allocation9 + $0x58] sm:$0xff]   ;;  %v1318_v38 = vld [vmem:[#allocation9 + $0x48] sm:$0xff]  }
  0x5c   :  { %v1317_v32 = vld [vmem:[#allocation9 + $0x50] sm:$0xff]   ;;  %v1322_v33 = vld [vmem:[#allocation9 + $0x18] sm:$0xff]   ;;  %v1326_v39 = vld [vmem:[#allocation9 + $0x8] sm:$0xff]  }
  0x5d   :  { %1169 = vmatpush3.bf16.msra.mxu0 %v1304_v3  ;;  %1189 = vmatpush3.bf16.msra.mxu1 %v1313_v12  ;;  %v1324_v36 = vld [vmem:[#allocation9 + $0x10] sm:$0xff]   ;;  %v1319_v40 = vld [vmem:[#allocation9 + $0x40] sm:$0xff]   ;;  %v1320_v42 = vld [vmem:[#allocation9 + $0x38] sm:$0xff]  }
  0x5e   :  { %1170 = vmatprep.subr.bf16.mxu0 %v1535_v1  ;;  %1190 = vmatprep.subr.bf16.mxu1 %v1535_v1  ;;  %v1327_v41 = vld [vmem:[#allocation9] sm:$0xff]   ;;  %v1321_v43 = vld [vmem:[#allocation9 + $0x30] sm:$0xff]   ;;  %v1323_v44 = vld [vmem:[#allocation9 + $0x28] sm:$0xff]  }
  0x5f   :  { %v1325_v45 = vld [vmem:[#allocation9 + $0x20] sm:$0xff]   ;;  %v1328_v59 = vld [vmem:[#allocation11 + $0x18] sm:$0xff]   ;;  %v1329_v61 = vld [vmem:[#allocation11 + $0x10] sm:$0xff]  }
  0x60   :  { %v1330_v62 = vld [vmem:[#allocation11 + $0x8] sm:$0xff]   ;;  %v1331_v63 = vld [vmem:[#allocation11] sm:$0xff]   ;;  %v1083_v2 = vld [vmem:[%s1779_s6] ss:$0 sm:$0xff] }
  0x61   :  { %1171 = vmatpush3.bf16.msra.mxu0 %v1305_v4  ;;  %1191 = vmatpush3.bf16.msra.mxu1 %v1314_v13 }
  0x62   :  { %1172 = vmatprep.subr.bf16.mxu0 %v1535_v1  ;;  %1192 = vmatprep.subr.bf16.mxu1 %v1535_v1 }
  0x65   :  { %1173 = vmatpush3.bf16.msra.mxu0 %v1306_v6  ;;  %1193 = vmatpush3.bf16.msra.mxu1 %v1315_v14 }
  0x66   :  { %1174 = vmatprep.subr.bf16.mxu0 %v1535_v1  ;;  %1198 = vmatprep.subr.bf16.mxu1 %v1535_v1 }
  0x69   :  { %1175 = vmatpush3.bf16.msra.mxu0 %v1307_v7 }
  0x6a   :  { %1176 = vmatprep.subr.bf16.mxu0 %v1535_v1 }
  0x6d   :  { %1177 = vmatpush3.bf16.msra.mxu0 %v1308_v8 }
  0x6e   :  { %1178 = vmatprep.subr.bf16.mxu0 %v1535_v1 }
  0x71   :  { %1179 = vmatpush3.bf16.msra.mxu0 %v1309_v9 }
  0x72   :  { %1180 = vmatprep.subr.bf16.mxu0 %v1535_v1 }
  0x75   :  { %1181 = vmatpush3.bf16.msra.mxu0 %v1310_v10 }
  0x76   :  { %1218 = vmatprep.subr.bf16.mxu0 %v1535_v1 }
  0x78   :  { %1183 = vmatmul.mubr.bf16.vlgmr.msra.gmra.mxu0 %v1680_v11 }
  0x79   :  { %1226 = vmatprep.mubr.msk.bf16.mxu0 %vm1536_vm0, %v1535_v1  ;;  %1219 = vmatpush3.bf16.msra.mxu0 %v1322_v33  ;;  %v1339_v33 = vld [vmem:[#allocation12 + $0x28] sm:$0xff]  }
  0x7a   :  { %1220 = vmatprep.subr.bf16.mxu0 %v1535_v1 }
  0x7d   :  { %1221 = vmatpush3.bf16.msra.mxu0 %v1324_v36 }
  0x7e   :  { %1222 = vmatprep.subr.bf16.mxu0 %v1535_v1 }
  0x81   :  { %1223 = vmatpush3.bf16.msra.mxu0 %v1326_v39 }
  0x82   :  { %1224 = vmatprep.subr.bf16.mxu0 %v1535_v1 }
  0x85   :  { %1225 = vmatpush3.bf16.msra.mxu0 %v1327_v41 }
  0x86   :  { %1230 = vmatprep.subr.bf16.mxu0 %v1535_v1 }
 0x138   :  { %v262_v16 = vpop.f32.mrf.mxu0 }
 0x139   :  { %v263_v17 = vadd.f32 %v1054_v15, %v262_v16  ;;  %v1084_v16 = vld [vmem:[%s1781_s8] ss:$0 sm:$0xff] }
 0x13a   :  { %v1184_v18 = vpop.f32.mrf.mxu0 }
 0x13b   :  { %v271_v20 = vmul.f32 0.2, %v263_v17  ;;  %vm269_vm1 = vcmp.ge.f32.partialorder %v263_v17, 0.0 }
 0x13c   :  { %v265_v19 = vpop.f32.mrf.mxu0 }
 0x13d   :  { %v266_v21 = vadd.f32 %v1054_v15, %v265_v19  ;;  %v273_v24 = vsel %vm269_vm1, %v263_v17, %v271_v20  ;;  %v1332_v19 = vld [vmem:[#allocation12 + $0x58] sm:$0xff]  }
 0x13e   :  { %v1185_v22 = vpop.f32.mrf.mxu0 }
 0x13f   :  { %vm270_vm2 = vcmp.ge.f32.partialorder %v266_v21, 0.0  ;;  %v272_v23 = vmul.f32 0.2, %v266_v21  ;;  %v1338_v22 = vld [vmem:[#allocation12 + $0x18] sm:$0xff]  }
 0x141   :  { %v274_v25 = vsel %vm270_vm2, %v266_v21, %v272_v23  ;;  %v1333_v21 = vld [vmem:[#allocation12 + $0x50] sm:$0xff]  }
 0x142   :  { %v275_v26 = vpack.c.bf16 %v274_v25, %v273_v24 }
 0x144   :  { %1195 = vmatmul.mubr.msk.bf16.vlgmr.msra.gmra.mxu1 %vm315_vm3, %v275_v26 }
 0x145   :  { %1214 = vmatprep.mubr.msk.bf16.mxu1 %vm1536_vm0, %v1535_v1  ;;  %1199 = vmatpush3.bf16.msra.mxu1 %v1316_v30  ;;  %v1343_v30 = vld [vmem:[#allocation12] sm:$0xff]  }
 0x146   :  { %1200 = vmatprep.subr.bf16.mxu1 %v1535_v1 }
 0x149   :  { %1201 = vmatpush3.bf16.msra.mxu1 %v1317_v32  ;;  %v1337_v32 = vld [vmem:[#allocation12 + $0x30] sm:$0xff]  }
 0x14a   :  { %1202 = vmatprep.subr.bf16.mxu1 %v1535_v1 }
 0x14d   :  { %1203 = vmatpush3.bf16.msra.mxu1 %v1318_v38 }
 0x14e   :  { %1204 = vmatprep.subr.bf16.mxu1 %v1535_v1 }
 0x151   :  { %1205 = vmatpush3.bf16.msra.mxu1 %v1319_v40 }
 0x152   :  { %1206 = vmatprep.subr.bf16.mxu1 %v1535_v1 }
 0x155   :  { %1207 = vmatpush3.bf16.msra.mxu1 %v1320_v42 }
 0x156   :  { %1208 = vmatprep.subr.bf16.mxu1 %v1535_v1 }
 0x159   :  { %1209 = vmatpush3.bf16.msra.mxu1 %v1321_v43 }
 0x15a   :  { %1210 = vmatprep.subr.bf16.mxu1 %v1535_v1 }
 0x15d   :  { %1211 = vmatpush3.bf16.msra.mxu1 %v1323_v44 }
 0x15e   :  { %1212 = vmatprep.subr.bf16.mxu1 %v1535_v1 }
 0x161   :  { %1213 = vmatpush3.bf16.msra.mxu1 %v1325_v45 }
 0x162   :  { %1242 = vmatprep.subr.bf16.mxu1 %v1535_v1 }
 0x164   :  { %1215 = vmatmul.mubr.bf16.vlgmr.msra.gmra.mxu1 %v1680_v11 }
 0x165   :  { %1258 = vmatprep.mubr.msk.bf16.mxu1 %vm1536_vm0, %v1535_v1  ;;  %1243 = vmatpush3.bf16.msra.mxu1 %v1332_v19 }
 0x166   :  { %1244 = vmatprep.subr.bf16.mxu1 %v1535_v1 }
 0x169   :  { %1245 = vmatpush3.bf16.msra.mxu1 %v1333_v21 }
 0x16a   :  { %1246 = vmatprep.subr.bf16.mxu1 %v1535_v1 }
 0x204   :  { %v353_v28 = vpop.f32.mrf.mxu1 }
 0x205   :  { %v354_v29 = vadd.f32 %v1064_v27, %v353_v28  ;;  %v1342_v28 = vld [vmem:[#allocation12 + $0x8] sm:$0xff]  }
 0x206   :  { %v1196_v31 = vpop.f32.mrf.mxu1 }
 0x207   :  { %362 = vrot.lane.b32.xlu0 %v354_v29, %s1528_s14  ;;  %v1335_v29 = vld [vmem:[#allocation12 + $0x40] sm:$0xff]   ;;  %v1336_v31 = vld [vmem:[#allocation12 + $0x38] sm:$0xff]  }
 0x208   :  { %v356_v34 = vpop.f32.mrf.mxu1 }
 0x209   :  { %v357_v35 = vadd.f32 %v1064_v27, %v356_v34  ;;  %v1334_v27 = vld [vmem:[#allocation12 + $0x48] sm:$0xff]   ;;  %v1341_v34 = vld [vmem:[#allocation12 + $0x20] sm:$0xff]  }
 0x20a   :  { %v1197_v37 = vpop.f32.mrf.mxu1  ;;  %1247 = vmatpush3.bf16.msra.mxu1 %v1334_v27  ;;  %v1111_v27 = vld [vmem:[#allocation2] ss:$0 sm:$0xff] }
 0x20b   :  { %364 = vrot.lane.b32.xlu0 %v357_v35, %s1528_s14  ;;  %1248 = vmatprep.subr.bf16.mxu1 %v1535_v1 }
 0x20e   :  { %1249 = vmatpush3.bf16.msra.mxu1 %v1335_v29 }
 0x20f   :  { %1250 = vmatprep.subr.bf16.mxu1 %v1535_v1 }
 0x212   :  { %1251 = vmatpush3.bf16.msra.mxu1 %v1336_v31 }
 0x213   :  { %1252 = vmatprep.subr.bf16.mxu1 %v1535_v1 }
 0x216   :  { %1253 = vmatpush3.bf16.msra.mxu1 %v1337_v32 }
 0x217   :  { %1254 = vmatprep.subr.bf16.mxu1 %v1535_v1 }
 0x21a   :  { %1255 = vmatpush3.bf16.msra.mxu1 %v1339_v33 }
 0x21b   :  { %1256 = vmatprep.subr.bf16.mxu1 %v1535_v1 }
 0x21e   :  { %1257 = vmatpush3.bf16.msra.mxu1 %v1341_v34 }
 0x221   :  { %1259 = vmatmul.mubr.bf16.vlgmr.msra.gmra.mxu1 %v1680_v11  ;;  %v1345_v11 = vld [vmem:[#allocation14 + $0x10] sm:$0xff]  }
 0x224   :  { %v483_v55 = vpop.f32.mrf.mxu1 }
 0x226   :  { %v1216_v56 = vpop.f32.mrf.mxu1 }
 0x228   :  { %v486_v57 = vpop.f32.mrf.mxu1 }
 0x22a   :  { %v1217_v58 = vpop.f32.mrf.mxu1 }
 0x279   :  { %v363_v46 = vpop.permute.xlu0 %362 }
 0x27a   :  { %v368_v47 = vadd.f32 %v363_v46, %v273_v24 }
 0x27c   :  { %v372_v49 = vmul.f32 0.2, %v368_v47  ;;  %vm370_vm4 = vcmp.ge.f32.partialorder %v368_v47, 0.0 }
 0x27d   :  { %v365_v48 = vpop.permute.xlu0 %364 }
 0x27e   :  { %v369_v50 = vadd.f32 %v365_v48, %v274_v25  ;;  %v374_v52 = vsel %vm370_vm4, %v368_v47, %v372_v49  ;;  %v1340_v25 = vld [vmem:[#allocation12 + $0x10] sm:$0xff]   ;;  %v1344_v48 = vld [vmem:[#allocation14 + $0x18] sm:$0xff]  }
 0x280   :  { %v373_v51 = vmul.f32 0.2, %v369_v50  ;;  %vm371_vm5 = vcmp.ge.f32.partialorder %v369_v50, 0.0 }
 0x282   :  { %v375_v53 = vsel %vm371_vm5, %v369_v50, %v373_v51  ;;  %v1346_v50 = vld [vmem:[#allocation14 + $0x8] sm:$0xff]   ;;  %v1347_v51 = vld [vmem:[#allocation14] sm:$0xff]  }
 0x283   :  { %v376_v54 = vpack.c.bf16 %v375_v53, %v374_v52  ;;  %v1103_v53 = vld [vmem:[%s1783_s10] ss:$0 sm:$0xff] }
 0x285   :  { %491 = vrot.lane.b32.xlu1 %v376_v54, %s1528_s14 }
 0x2e1   :  { %v783_v44 = vpop.f32.mrf.mxu1 }
 0x2e3   :  { %v1260_v45 = vpop.f32.mrf.mxu1 }
 0x2e5   :  { %v786_v46 = vpop.f32.mrf.mxu1 }
 0x2e7   :  { %v1261_v47 = vpop.f32.mrf.mxu1 }
 0x2f7   :  { %v492_v60 = vpop.permute.xlu1 %491 }
 0x2f8   :  { %1227 = vmatmul.mubr.msk.bf16.vlgmr.msra.gmra.mxu0 %vm315_vm3, %v492_v60 }
 0x2f9   :  { %1231 = vmatpush3.bf16.msra.mxu0 %v1328_v59  ;;  %1238 = vmatprep.mubr.msk.bf16.mxu0 %vm1536_vm0, %v1535_v1 }
 0x2fa   :  { %1232 = vmatprep.subr.bf16.mxu0 %v1535_v1 }
 0x2fd   :  { %1233 = vmatpush3.bf16.msra.mxu0 %v1329_v61 }
 0x2fe   :  { %1234 = vmatprep.subr.bf16.mxu0 %v1535_v1 }
 0x301   :  { %1235 = vmatpush3.bf16.msra.mxu0 %v1330_v62 }
 0x302   :  { %1236 = vmatprep.subr.bf16.mxu0 %v1535_v1 }
 0x305   :  { %1237 = vmatpush3.bf16.msra.mxu0 %v1331_v63 }
 0x306   :  { %1262 = vmatprep.subr.bf16.mxu0 %v1535_v1 }
 0x3b8   :  { %v554_v0 = vpop.f32.mrf.mxu0 }
 0x3b9   :  { %v555_v3 = vadd.f32 %v554_v0, %v483_v55 }
 0x3ba   :  { %v1228_v4 = vpop.f32.mrf.mxu0 }
 0x3bb   :  { %v568_v5 = vadd.f32 %v1083_v2, %v555_v3 }
 0x3bc   :  { %v557_v6 = vpop.f32.mrf.mxu0 }
 0x3bd   :  { %v558_v7 = vadd.f32 %v557_v6, %v486_v57  ;;  %v572_v9 = vmul.f32 0.2, %v568_v5  ;;  %vm570_vm6 = vcmp.ge.f32.partialorder %v568_v5, 0.0 }
 0x3be   :  { %v1229_v8 = vpop.f32.mrf.mxu0 }
 0x3bf   :  { %v569_v10 = vadd.f32 %v1083_v2, %v558_v7  ;;  %v574_v13 = vsel %vm570_vm6, %v568_v5, %v572_v9  ;;  %v1104_v2 = vld [vmem:[%s1785_s12] ss:$0 sm:$0xff]  ;;  %s1538_s12 = smov [#allocation15]  }
 0x3c0   :  { %v1110_v7 = vld [vmem:[%s1786_s13] ss:$0 sm:$0xff]  ;;  %s1039_s13 = sshll.u32 %s1538_s12, 4  ;;  %s1040_s13 = int_to_ptr.vmem [resolvable:$true] %s1039_s13 }
 0x3c1   :  { %vm571_vm7 = vcmp.ge.f32.partialorder %v569_v10, 0.0  ;;  %v573_v12 = vmul.f32 0.2, %v569_v10  ;;  %p1501_p8 = scmp.lt.s32.totalorder %s1040_s13, %s1040_s13 }
 0x3c3   :  { %v575_v14 = vsel %vm571_vm7, %v569_v10, %v573_v12 }
 0x3c4   :  { %v576_v15 = vpack.c.bf16 %v575_v14, %v574_v13 }
 0x3c6   :  { %1239 = vmatmul.mubr.msk.bf16.vlgmr.msra.gmra.mxu0 %vm315_vm3, %v576_v15 }
 0x3c7   :  { %1270 = vmatprep.mubr.msk.bf16.mxu0 %vm1536_vm0, %v1535_v1  ;;  %1263 = vmatpush3.bf16.msra.mxu0 %v1338_v22 }
 0x3c8   :  { %1264 = vmatprep.subr.bf16.mxu0 %v1535_v1 }
 0x3cb   :  { %1265 = vmatpush3.bf16.msra.mxu0 %v1340_v25 }
 0x3cc   :  { %1266 = vmatprep.subr.bf16.mxu0 %v1535_v1 }
 0x3cf   :  { %1267 = vmatpush3.bf16.msra.mxu0 %v1342_v28 }
 0x3d0   :  { %1268 = vmatprep.subr.bf16.mxu0 %v1535_v1 }
 0x3d3   :  { %1269 = vmatpush3.bf16.msra.mxu0 %v1343_v30 }
 0x3d4   :  { %1274 = vmatprep.subr.bf16.mxu0 %v1535_v1 }
 0x486   :  { %v653_v17 = vpop.f32.mrf.mxu0 }
 0x487   :  { %v654_v18 = vadd.f32 %v1084_v16, %v653_v17 }
 0x488   :  { %v1240_v20 = vpop.f32.mrf.mxu0 }
 0x489   :  { %662 = vrot.lane.b32.xlu1 %v654_v18, %s1528_s14 }
 0x48a   :  { %v656_v23 = vpop.f32.mrf.mxu0 }
 0x48b   :  { %v657_v24 = vadd.f32 %v1084_v16, %v656_v23 }
 0x48c   :  { %v1241_v26 = vpop.f32.mrf.mxu0 }
 0x48d   :  { %664 = vrot.lane.b32.xlu0 %v657_v24, %s1528_s14  ;;  %v1537_v26 = vmov 0  }
 0x48e   :  { %1301 = vset.pattern.permute.xlu0 %v1537_v26  ;;  %1302 = vset.pattern.permute.xlu1 %v1537_v26 }
 0x4fb   :  { %v663_v35 = vpop.permute.xlu1 %662 }
 0x4fc   :  { %v668_v36 = vadd.f32 %v663_v35, %v574_v13 }
 0x4fe   :  { %v672_v38 = vmul.f32 0.2, %v668_v36  ;;  %vm670_vm8 = vcmp.ge.f32.partialorder %v668_v36, 0.0 }
 0x4ff   :  { %v665_v37 = vpop.permute.xlu0 %664 }
 0x500   :  { %v669_v39 = vadd.f32 %v665_v37, %v575_v14  ;;  %v674_v41 = vsel %vm670_vm8, %v668_v36, %v672_v38 }
 0x502   :  { %v673_v40 = vmul.f32 0.2, %v669_v39  ;;  %vm671_vm9 = vcmp.ge.f32.partialorder %v669_v39, 0.0 }
 0x504   :  { %v675_v42 = vsel %vm671_vm9, %v669_v39, %v673_v40 }
 0x505   :  { %v676_v43 = vpack.c.bf16 %v675_v42, %v674_v41 }
 0x507   :  { %791 = vrot.lane.b32.xlu1 %v676_v43, %s1528_s14 }
 0x579   :  { %v792_v49 = vpop.permute.xlu1 %791 }
 0x57a   :  { %1271 = vmatmul.mubr.msk.bf16.vlgmr.msra.gmra.mxu0 %vm315_vm3, %v792_v49 }
 0x57b   :  { %1275 = vmatpush3.bf16.msra.mxu0 %v1344_v48  ;;  %1282 = vmatprep.mubr.msk.bf16.mxu0 %vm1536_vm0, %v1535_v1 }
 0x57c   :  { %1276 = vmatprep.subr.bf16.mxu0 %v1535_v1 }
 0x57f   :  { %1277 = vmatpush3.bf16.msra.mxu0 %v1345_v11 }
 0x580   :  { %1278 = vmatprep.subr.bf16.mxu0 %v1535_v1 }
 0x583   :  { %1279 = vmatpush3.bf16.msra.mxu0 %v1346_v50 }
 0x584   :  { %1280 = vmatprep.subr.bf16.mxu0 %v1535_v1 }
 0x587   :  { %1281 = vmatpush3.bf16.msra.mxu0 %v1347_v51 }
 0x63a   :  { %v854_v52 = vpop.f32.mrf.mxu0 }
 0x63b   :  { %v855_v54 = vadd.f32 %v854_v52, %v783_v44 }
 0x63c   :  { %v1272_v55 = vpop.f32.mrf.mxu0 }
 0x63d   :  { %v868_v56 = vadd.f32 %v1103_v53, %v855_v54 }
 0x63e   :  { %v857_v57 = vpop.f32.mrf.mxu0 }
 0x63f   :  { %v858_v58 = vadd.f32 %v857_v57, %v786_v46  ;;  %v872_v60 = vmul.f32 0.2, %v868_v56  ;;  %vm870_vm10 = vcmp.ge.f32.partialorder %v868_v56, 0.0 }
 0x640   :  { %v1273_v59 = vpop.f32.mrf.mxu0 }
 0x641   :  { %v869_v61 = vadd.f32 %v1103_v53, %v858_v58  ;;  %v874_v63 = vsel %vm870_vm10, %v868_v56, %v872_v60 }
 0x643   :  { %vm871_vm11 = vcmp.ge.f32.partialorder %v869_v61, 0.0  ;;  %v873_v62 = vmul.f32 0.2, %v869_v61 }
 0x645   :  { %v875_v1 = vsel %vm871_vm11, %v869_v61, %v873_v62 }
 0x646   :  { %v876_v0 = vpack.c.bf16 %v875_v1, %v874_v63 }
 0x648   :  { %1283 = vmatmul.mubr.msk.bf16.vlgmr.msra.gmra.mxu0 %vm315_vm3, %v876_v0 }
 0x708   :  { %v953_v3 = vpop.f32.mrf.mxu0 }
 0x709   :  { %v954_v4 = vadd.f32 %v1104_v2, %v953_v3 }
 0x70a   :  { %v1284_v5 = vpop.f32.mrf.mxu0 }
 0x70b   :  { %962 = vrot.lane.b32.xlu0 %v954_v4, %s1528_s14 }
 0x70c   :  { %v956_v6 = vpop.f32.mrf.mxu0 }
 0x70d   :  { %v957_v8 = vadd.f32 %v1104_v2, %v956_v6 }
 0x70e   :  { %v1285_v9 = vpop.f32.mrf.mxu0 }
 0x70f   :  { %964 = vrot.lane.b32.xlu1 %v957_v8, %s1528_s14  ;;  %982 = vrot.lane.b32.xlu0 %v1110_v7, %s1528_s14 }
 0x77d   :  { %v963_v10 = vpop.permute.xlu0 %962 }
 0x77e   :  { %v968_v12 = vadd.f32 %v963_v10, %v874_v63 }
 0x780   :  { %v972_v13 = vmul.f32 0.2, %v968_v12  ;;  %vm970_vm12 = vcmp.ge.f32.partialorder %v968_v12, 0.0 }
 0x781   :  { %v965_v14 = vpop.permute.xlu1 %964  ;;  %v983_v15 = vpop.permute.xlu0 %982 }
 0x782   :  { %v969_v16 = vadd.f32 %v965_v14, %v875_v1  ;;  %v974_v17 = vsel %vm970_vm12, %v968_v12, %v972_v13 }
 0x783   :  { %v985_v18 = vmul.f32 %v983_v15, %v974_v17 }
 0x784   :  { %v973_v19 = vmul.f32 0.2, %v969_v16  ;;  %vm971_vm13 = vcmp.ge.f32.partialorder %v969_v16, 0.0 }
 0x785   :  { %989 = vrot.lane.b32.xlu1 %v985_v18, %s1528_s14 }
 0x786   :  { %v975_v20 = vsel %vm971_vm13, %v969_v16, %v973_v19 }
 0x787   :  { %v986_v21 = vmul.f32 %v983_v15, %v975_v20 }
 0x789   :  { %991 = vrot.lane.b32.xlu0 %v986_v21, %s1528_s14  ;;  %s1496_s14 = scalar_lea.vmem %s1040_s13, 256 }
 0x78a   :  { %p1497_p7 = scmp.ne.s32.totalorder %s1040_s13, %s1496_s14  ;;  %p1502_p9 = scmp.lt.s32.totalorder %s1496_s14, %s1496_s14 }
 0x78c   :  { %p1503_p10 = por %p1502_p9, %p1501_p8 }
 0x78e   :  { %p1504_p11 = pnand %p1503_p10, %p1497_p7 }
 0x7f7   :  { %v990_v22 = vpop.permute.xlu1 %989 }
 0x7f8   :  { %v995_v23 = vsel %vm315_vm3, %v990_v22, 0.0 }
 0x7f9   :  { %996 = vadd.xlane.f32.xlu1 %v995_v23 }
 0x7fb   :  { %v992_v24 = vpop.permute.xlu0 %991 }
 0x7fc   :  { %v998_v25 = vsel %vm315_vm3, %v992_v24, 0.0 }
 0x7fd   :  { %999 = vadd.xlane.f32.xlu0 %v998_v25 }
 0x882   :  { %v997_v28 = vpop.xlane.xlu1 %996 }
 0x883   :  { %v1008_v29 = vadd.f32 %v1111_v27, %v997_v28 }
 0x885   :  { %v1112_v30 = vmul.f32 -1.442695, %v1008_v29 }
 0x886   :  { %v1000_v31 = vpop.xlane.xlu0 %999 }
 0x887   :  { %1348 = vpow2.f32 %v1112_v30  ;;  %v1009_v32 = vadd.f32 %v1111_v27, %v1000_v31 }
 0x889   :  { %v1113_v33 = vmul.f32 -1.442695, %v1009_v32 }
 0x88b   :  { %1350 = vpow2.f32 %v1113_v33 }
 0x894   :  { %v1349_v34 = vpop.eup %1348 }
 0x895   :  { %v1016_v35 = vadd.f32 1.0, %v1349_v34 }
 0x897   :  { %1352 = vrcp.f32 %v1016_v35 }
 0x898   :  { %v1351_v36 = vpop.eup %1350 }
 0x899   :  { %v1017_v37 = vadd.f32 1.0, %v1351_v36 }
 0x89b   :  { %1354 = vrcp.f32 %v1017_v37 }
 0x8a4   :  { %v1353_v38 = vpop.eup %1352 }
 0x8a5   :  { %1024 = vperm.xlu0 %1301, %v1353_v38  }
 0x8a8   :  { %v1355_v39 = vpop.eup %1354 }
 0x8a9   :  { %1029 = vperm.xlu1 %1302, %v1355_v39  }
 0x920   :  { %v1025_v40 = vpop.permute.xlu0 %1024 }
 0x921   :  { %1032 = vst [vmem:[#allocation15] sm:$0xff] %v1025_v40 }
 0x924   :  { %v1030_v41 = vpop.permute.xlu1 %1029 }
 0x925   :  { %1033 = vst [vmem:[#allocation15 + $0x8] sm:$0xff] %v1030_v41 }
 0x926   :  { %1507 = shalt.err (!%p1504_p11)
}
 0x927   :  { %s1539_s27 = smov 128   ;;  %s1540_s28 = smov 8  }
 0x928   :  { %1045 = dma.vmem_to_hbm [thread:$0]  %s1040_s13, 256, %s1788_s15, [#allocation5], %s1539_s27, %s1539_s27, %s1540_s28  }
 0x929   :  { %1524 = dma.done.wait [#allocation5], 256  }
 0x92a   :  { %1525 = vsyncadd [#allocation5], 4294967040 }
 0x92b   :  { %1049 = vsyncpa [#allocation4], 1 }
 0x92c   :  { %1050 = vsyncpa [#allocation7], 1 }
 0x92d   :  { %1051 = vsyncpa [#allocation10], 1 }
 0x92e   :  { %1052 = vsyncpa [#allocation13], 1 }
 0x92f   :  { %1053 = vsyncpa [#allocation5], 1 }

// kernel: tpu_custom_call.1
= control target key start
LH: loop header
LB: loop body
LE: loop exit
PB: predicated region body
PF: predicated region fallthrough
CT: control target
= control target key end

     0   :  { %s1773_s0 = inlined_call_operand.hbm [shape: bf16[16,128], index: 0, kind: input, shape index: {}]   ;;  %s1774_s1 = inlined_call_operand.hbm [shape: bf16[128,128], index: 1, kind: input, shape index: {}]   ;;  %s1775_s2 = inlined_call_operand.vmem [shape: f32[1,128], index: 2, kind: input, shape index: {}]   ;;  %s1776_s3 = inlined_call_operand.hbm [shape: bf16[64,64], index: 3, kind: input, shape index: {}]   ;;  %s1777_s4 = inlined_call_operand.vmem [shape: f32[1,64], index: 4, kind: input, shape index: {}]   ;;  %s1778_s5 = inlined_call_operand.hbm [shape: bf16[192,128], index: 5, kind: input, shape index: {}]   ;;  %s1779_s6 = inlined_call_operand.vmem [shape: f32[1,128], index: 6, kind: input, shape index: {}]   ;;  %s1780_s7 = inlined_call_operand.hbm [shape: bf16[64,64], index: 7, kind: input, shape index: {}]   ;;  %s1781_s8 = inlined_call_operand.vmem [shape: f32[1,64], index: 8, kind: input, shape index: {}]   ;;  %s1782_s9 = inlined_call_operand.hbm [shape: bf16[192,128], index: 9, kind: input, shape index: {}]   ;;  %s1783_s10 = inlined_call_operand.vmem [shape: f32[1,128], index: 10, kind: input, shape index: {}]   ;;  %s1784_s11 = inlined_call_operand.hbm [shape: bf16[64,64], index: 11, kind: input, shape index: {}]   ;;  %s1785_s12 = inlined_call_operand.vmem [shape: f32[1,64], index: 12, kind: input, shape index: {}]   ;;  %s1786_s13 = inlined_call_operand.vmem [shape: f32[1,64], index: 13, kind: input, shape index: {}]   ;;  %s1787_s14 = inlined_call_operand.<no memory space> [shape: f32[1,1], index: 14, kind: input, shape index: {}]   ;;  %s1788_s15 = inlined_call_operand.hbm [shape: f32[16,128], index: 15, kind: output, shape index: {}]  }
   0x1   :  { %v20_v0 = vstv %s1787_s14 }
   0x2   :  { %21 = vst [vmem:[#allocation2] sm:$0x1] %v20_v0 }
   0x3   :  { %22 = vsyncpa [#allocation4], 0 }
   0x4   :  { %23 = vsyncpa [#allocation7], 0 }
   0x5   :  { %24 = vsyncpa [#allocation10], 0 }
   0x6   :  { %25 = vsyncpa [#allocation13], 0 }
   0x7   :  { %26 = vsyncpa [#allocation5], 0  ;;  %s1526_s20 = smov [#allocation6]   ;;  %s1527_s22 = smov [#allocation9]  }
   0x8   :  { %s44_s21 = sshll.u32 %s1526_s20, 4  ;;  %s72_s23 = sshll.u32 %s1527_s22, 4  ;;  %s45_s21 = int_to_ptr.vmem [resolvable:$true] %s44_s21  ;;  %s73_s23 = int_to_ptr.vmem [resolvable:$true] %s72_s23 }
   0x9   :  { %s1364_s24 = scalar_lea.vmem %s45_s21, 1024  ;;  %p1369_p1 = scmp.lt.s32.totalorder %s45_s21, %s45_s21 }
   0xa   :  { %p1365_p0 = scmp.ne.s32.totalorder %s45_s21, %s1364_s24  ;;  %p1370_p2 = scmp.lt.s32.totalorder %s1364_s24, %s1364_s24 }
   0xc   :  { %p1371_p3 = por %p1370_p2, %p1369_p1 }
   0xe   :  { %p1372_p4 = pnand %p1371_p3, %p1365_p0 }
  0x10   :  { %1375 = shalt.err (!%p1372_p4)
}
  0x11   :  { %s1528_s14 = smov 64   ;;  %s1529_s25 = smov 4  }
  0x12   :  { %50 = dma.hbm_to_vmem [thread:$0]  %s1774_s1, 1024, %s45_s21, [#allocation7], %s1528_s14, %s1528_s14, %s1529_s25  }
  0x13   :  { %s1384_s28 = scalar_lea.vmem %s73_s23, 1536  ;;  %p1389_p6 = scmp.lt.s32.totalorder %s73_s23, %s73_s23 }
  0x14   :  { %p1385_p5 = scmp.ne.s32.totalorder %s73_s23, %s1384_s28  ;;  %p1390_p7 = scmp.lt.s32.totalorder %s1384_s28, %s1384_s28 }
  0x16   :  { %p1391_p8 = por %p1390_p7, %p1389_p6 }
  0x18   :  { %p1392_p9 = pnand %p1391_p8, %p1385_p5 }
  0x1a   :  { %1395 = shalt.err (!%p1392_p9)
}
  0x1b   :  { %78 = dma.hbm_to_vmem [thread:$0]  %s1778_s5, 1536, %s73_s23, [#allocation10], %s1528_s14, %s1528_s14, %s1529_s25  }
  0x1c   :  { %s1530_s16 = smov [#allocation12]   ;;  %s1531_s18 = smov [#allocation3]  }
  0x1d   :  { %s100_s17 = sshll.u32 %s1530_s16, 4  ;;  %s32_s19 = sshll.u32 %s1531_s18, 4  ;;  %s101_s17 = int_to_ptr.vmem [resolvable:$true] %s100_s17  ;;  %s33_s19 = int_to_ptr.vmem [resolvable:$true] %s32_s19 }
  0x1e   :  { %s1404_s1 = scalar_lea.vmem %s101_s17, 1536  ;;  %p1409_p11 = scmp.lt.s32.totalorder %s101_s17, %s101_s17 }
  0x1f   :  { %p1405_p10 = scmp.ne.s32.totalorder %s101_s17, %s1404_s1  ;;  %p1410_p12 = scmp.lt.s32.totalorder %s1404_s1, %s1404_s1 }
  0x21   :  { %p1411_p13 = por %p1410_p12, %p1409_p11 }
  0x23   :  { %p1412_p0 = pnand %p1411_p13, %p1405_p10 }
  0x25   :  { %1415 = shalt.err (!%p1412_p0)
}
  0x26   :  { %106 = dma.hbm_to_vmem [thread:$0]  %s1782_s9, 1536, %s101_s17, [#allocation13], %s1528_s14, %s1528_s14, %s1529_s25  }
  0x27   :  { %s1424_s5 = scalar_lea.vmem %s33_s19, 128  ;;  %p1429_p2 = scmp.lt.s32.totalorder %s33_s19, %s33_s19 }
  0x28   :  { %p1425_p1 = scmp.ne.s32.totalorder %s33_s19, %s1424_s5  ;;  %p1430_p3 = scmp.lt.s32.totalorder %s1424_s5, %s1424_s5 }
  0x2a   :  { %p1431_p4 = por %p1430_p3, %p1429_p2 }
  0x2c   :  { %p1432_p5 = pnand %p1431_p4, %p1425_p1 }
  0x2e   :  { %1435 = shalt.err (!%p1432_p5)
}
  0x2f   :  { %38 = dma.hbm_to_vmem [thread:$0]  %s1773_s0, 128, %s33_s19, [#allocation4], %s1528_s14, %s1528_s14, %s1529_s25  }
  0x30   :  { %s1532_s24 = smov [#allocation8]   ;;  %s1533_s27 = smov [#allocation11]  }
  0x31   :  { %s58_s26 = sshll.u32 %s1532_s24, 4  ;;  %s86_s28 = sshll.u32 %s1533_s27, 4  ;;  %s59_s26 = int_to_ptr.vmem [resolvable:$true] %s58_s26  ;;  %s87_s28 = int_to_ptr.vmem [resolvable:$true] %s86_s28 }
  0x32   :  { %s1444_s9 = scalar_lea.vmem %s59_s26, 512  ;;  %p1449_p7 = scmp.lt.s32.totalorder %s59_s26, %s59_s26 }
  0x33   :  { %p1445_p6 = scmp.ne.s32.totalorder %s59_s26, %s1444_s9  ;;  %p1450_p8 = scmp.lt.s32.totalorder %s1444_s9, %s1444_s9 }
  0x35   :  { %p1451_p9 = por %p1450_p8, %p1449_p7 }
  0x37   :  { %p1452_p10 = pnand %p1451_p9, %p1445_p6 }
  0x39   :  { %1455 = shalt.err (!%p1452_p10)
}
  0x3a   :  { %64 = dma.hbm_to_vmem [thread:$0]  %s1776_s3, 512, %s59_s26, [#allocation7], %s1528_s14, %s1528_s14, %s1529_s25  }
  0x3b   :  { %s1464_s0 = scalar_lea.vmem %s87_s28, 512  ;;  %p1469_p12 = scmp.lt.s32.totalorder %s87_s28, %s87_s28 }
  0x3c   :  { %p1465_p11 = scmp.ne.s32.totalorder %s87_s28, %s1464_s0  ;;  %p1470_p13 = scmp.lt.s32.totalorder %s1464_s0, %s1464_s0 }
  0x3e   :  { %p1471_p0 = por %p1470_p13, %p1469_p12 }
  0x40   :  { %p1472_p1 = pnand %p1471_p0, %p1465_p11 }
  0x42   :  { %1475 = shalt.err (!%p1472_p1)
}
  0x43   :  { %92 = dma.hbm_to_vmem [thread:$0]  %s1780_s7, 512, %s87_s28, [#allocation10], %s1528_s14, %s1528_s14, %s1529_s25  }
  0x44   :  { %s1534_s18 = smov [#allocation14]  }
  0x45   :  { %s114_s19 = sshll.u32 %s1534_s18, 4  ;;  %s115_s19 = int_to_ptr.vmem [resolvable:$true] %s114_s19 }
  0x46   :  { %s1484_s1 = scalar_lea.vmem %s115_s19, 512  ;;  %p1489_p3 = scmp.lt.s32.totalorder %s115_s19, %s115_s19 }
  0x47   :  { %p1485_p2 = scmp.ne.s32.totalorder %s115_s19, %s1484_s1  ;;  %p1490_p4 = scmp.lt.s32.totalorder %s1484_s1, %s1484_s1 }
  0x49   :  { %p1491_p5 = por %p1490_p4, %p1489_p3 }
  0x4b   :  { %p1492_p6 = pnand %p1491_p5, %p1485_p2 }
  0x4d   :  { %1495 = shalt.err (!%p1492_p6)
}
  0x4e   :  { %120 = dma.hbm_to_vmem [thread:$0]  %s1784_s11, 512, %s115_s19, [#allocation13], %s1528_s14, %s1528_s14, %s1529_s25  }
  0x4f   :  { %1516 = dma.done.wait [#allocation4], 128  }
  0x50   :  { %1517 = vsyncadd [#allocation4], 4294967168 }
  0x51   :  { %1518 = dma.done.wait [#allocation7], 1536  }
  0x52   :  { %1519 = vsyncadd [#allocation7], 4294965760 }
  0x53   :  { %1520 = dma.done.wait [#allocation10], 2048  }
  0x54   :  { %1521 = vsyncadd [#allocation10], 4294965248 }
  0x55   :  { %1522 = dma.done.wait [#allocation13], 2048  }
  0x56   :  { %1523 = vsyncadd [#allocation13], 4294965248  ;;  %v1535_v1 = vmov 0.0   ;;  %vm1536_vm0 = vmmov 0   ;;  %v1303_v2 = vld [vmem:[#allocation6 + $0x38] sm:$0xff]   ;;  %v1304_v3 = vld [vmem:[#allocation6 + $0x30] sm:$0xff]  }
  0x57   :  { %1166 = vmatprep.subr.bf16.mxu0 %v1535_v1  ;;  %1182 = vmatprep.mubr.msk.bf16.mxu0 %vm1536_vm0, %v1535_v1  ;;  %v1305_v4 = vld [vmem:[#allocation6 + $0x28] sm:$0xff]   ;;  %v1312_v5 = vld [vmem:[#allocation8 + $0x18] sm:$0xff]   ;;  %v1306_v6 = vld [vmem:[#allocation6 + $0x20] sm:$0xff]   ;;  %vm315_vm3 = vcmask 523264  }
  0x58   :  { %1186 = vmatprep.subr.bf16.mxu1 %v1535_v1  ;;  %1194 = vmatprep.mubr.msk.bf16.mxu1 %vm1536_vm0, %v1535_v1  ;;  %v1307_v7 = vld [vmem:[#allocation6 + $0x18] sm:$0xff]   ;;  %v1308_v8 = vld [vmem:[#allocation6 + $0x10] sm:$0xff]   ;;  %v1309_v9 = vld [vmem:[#allocation6 + $0x8] sm:$0xff]  }
  0x59   :  { %1167 = vmatpush3.bf16.msra.mxu0 %v1303_v2  ;;  %1187 = vmatpush3.bf16.msra.mxu1 %v1312_v5  ;;  %v1310_v10 = vld [vmem:[#allocation6] sm:$0xff]   ;;  %v1680_v11 = vld [vmem:[#allocation3] sm:$0xff]   ;;  %v1313_v12 = vld [vmem:[#allocation8 + $0x10] sm:$0xff]  }
  0x5a   :  { %1168 = vmatprep.subr.bf16.mxu0 %v1535_v1  ;;  %1188 = vmatprep.subr.bf16.mxu1 %v1535_v1  ;;  %v1314_v13 = vld [vmem:[#allocation8 + $0x8] sm:$0xff]   ;;  %v1315_v14 = vld [vmem:[#allocation8] sm:$0xff]   ;;  %v1054_v15 = vld [vmem:[%s1775_s2] ss:$0 sm:$0xff] }
  0x5b   :  { %v1064_v27 = vld [vmem:[%s1777_s4] ss:$0 sm:$0xff]  ;;  %v1316_v30 = vld [vmem:[#allocation9 + $0x58] sm:$0xff]   ;;  %v1318_v38 = vld [vmem:[#allocation9 + $0x48] sm:$0xff]  }
  0x5c   :  { %v1317_v32 = vld [vmem:[#allocation9 + $0x50] sm:$0xff]   ;;  %v1322_v33 = vld [vmem:[#allocation9 + $0x18] sm:$0xff]   ;;  %v1326_v39 = vld [vmem:[#allocation9 + $0x8] sm:$0xff]  }
  0x5d   :  { %1169 = vmatpush3.bf16.msra.mxu0 %v1304_v3  ;;  %1189 = vmatpush3.bf16.msra.mxu1 %v1313_v12  ;;  %v1324_v36 = vld [vmem:[#allocation9 + $0x10] sm:$0xff]   ;;  %v1319_v40 = vld [vmem:[#allocation9 + $0x40] sm:$0xff]   ;;  %v1320_v42 = vld [vmem:[#allocation9 + $0x38] sm:$0xff]  }
  0x5e   :  { %1170 = vmatprep.subr.bf16.mxu0 %v1535_v1  ;;  %1190 = vmatprep.subr.bf16.mxu1 %v1535_v1  ;;  %v1327_v41 = vld [vmem:[#allocation9] sm:$0xff]   ;;  %v1321_v43 = vld [vmem:[#allocation9 + $0x30] sm:$0xff]   ;;  %v1323_v44 = vld [vmem:[#allocation9 + $0x28] sm:$0xff]  }
  0x5f   :  { %v1325_v45 = vld [vmem:[#allocation9 + $0x20] sm:$0xff]   ;;  %v1328_v59 = vld [vmem:[#allocation11 + $0x18] sm:$0xff]   ;;  %v1329_v61 = vld [vmem:[#allocation11 + $0x10] sm:$0xff]  }
  0x60   :  { %v1330_v62 = vld [vmem:[#allocation11 + $0x8] sm:$0xff]   ;;  %v1331_v63 = vld [vmem:[#allocation11] sm:$0xff]   ;;  %v1083_v2 = vld [vmem:[%s1779_s6] ss:$0 sm:$0xff] }
  0x61   :  { %1171 = vmatpush3.bf16.msra.mxu0 %v1305_v4  ;;  %1191 = vmatpush3.bf16.msra.mxu1 %v1314_v13 }
  0x62   :  { %1172 = vmatprep.subr.bf16.mxu0 %v1535_v1  ;;  %1192 = vmatprep.subr.bf16.mxu1 %v1535_v1 }
  0x65   :  { %1173 = vmatpush3.bf16.msra.mxu0 %v1306_v6  ;;  %1193 = vmatpush3.bf16.msra.mxu1 %v1315_v14 }
  0x66   :  { %1174 = vmatprep.subr.bf16.mxu0 %v1535_v1  ;;  %1198 = vmatprep.subr.bf16.mxu1 %v1535_v1 }
  0x69   :  { %1175 = vmatpush3.bf16.msra.mxu0 %v1307_v7 }
  0x6a   :  { %1176 = vmatprep.subr.bf16.mxu0 %v1535_v1 }
  0x6d   :  { %1177 = vmatpush3.bf16.msra.mxu0 %v1308_v8 }
  0x6e   :  { %1178 = vmatprep.subr.bf16.mxu0 %v1535_v1 }
  0x71   :  { %1179 = vmatpush3.bf16.msra.mxu0 %v1309_v9 }
  0x72   :  { %1180 = vmatprep.subr.bf16.mxu0 %v1535_v1 }
  0x75   :  { %1181 = vmatpush3.bf16.msra.mxu0 %v1310_v10 }
  0x76   :  { %1218 = vmatprep.subr.bf16.mxu0 %v1535_v1 }
  0x78   :  { %1183 = vmatmul.mubr.bf16.vlgmr.msra.gmra.mxu0 %v1680_v11 }
  0x79   :  { %1226 = vmatprep.mubr.msk.bf16.mxu0 %vm1536_vm0, %v1535_v1  ;;  %1219 = vmatpush3.bf16.msra.mxu0 %v1322_v33  ;;  %v1339_v33 = vld [vmem:[#allocation12 + $0x28] sm:$0xff]  }
  0x7a   :  { %1220 = vmatprep.subr.bf16.mxu0 %v1535_v1 }
  0x7d   :  { %1221 = vmatpush3.bf16.msra.mxu0 %v1324_v36 }
  0x7e   :  { %1222 = vmatprep.subr.bf16.mxu0 %v1535_v1 }
  0x81   :  { %1223 = vmatpush3.bf16.msra.mxu0 %v1326_v39 }
  0x82   :  { %1224 = vmatprep.subr.bf16.mxu0 %v1535_v1 }
  0x85   :  { %1225 = vmatpush3.bf16.msra.mxu0 %v1327_v41 }
  0x86   :  { %1230 = vmatprep.subr.bf16.mxu0 %v1535_v1 }
 0x138   :  { %v262_v16 = vpop.f32.mrf.mxu0 }
 0x139   :  { %v263_v17 = vadd.f32 %v1054_v15, %v262_v16  ;;  %v1084_v16 = vld [vmem:[%s1781_s8] ss:$0 sm:$0xff] }
 0x13a   :  { %v1184_v18 = vpop.f32.mrf.mxu0 }
 0x13b   :  { %v271_v20 = vmul.f32 0.2, %v263_v17  ;;  %vm269_vm1 = vcmp.ge.f32.partialorder %v263_v17, 0.0 }
 0x13c   :  { %v265_v19 = vpop.f32.mrf.mxu0 }
 0x13d   :  { %v266_v21 = vadd.f32 %v1054_v15, %v265_v19  ;;  %v273_v24 = vsel %vm269_vm1, %v263_v17, %v271_v20  ;;  %v1332_v19 = vld [vmem:[#allocation12 + $0x58] sm:$0xff]  }
 0x13e   :  { %v1185_v22 = vpop.f32.mrf.mxu0 }
 0x13f   :  { %vm270_vm2 = vcmp.ge.f32.partialorder %v266_v21, 0.0  ;;  %v272_v23 = vmul.f32 0.2, %v266_v21  ;;  %v1338_v22 = vld [vmem:[#allocation12 + $0x18] sm:$0xff]  }
 0x141   :  { %v274_v25 = vsel %vm270_vm2, %v266_v21, %v272_v23  ;;  %v1333_v21 = vld [vmem:[#allocation12 + $0x50] sm:$0xff]  }
 0x142   :  { %v275_v26 = vpack.c.bf16 %v274_v25, %v273_v24 }
 0x144   :  { %1195 = vmatmul.mubr.msk.bf16.vlgmr.msra.gmra.mxu1 %vm315_vm3, %v275_v26 }
 0x145   :  { %1214 = vmatprep.mubr.msk.bf16.mxu1 %vm1536_vm0, %v1535_v1  ;;  %1199 = vmatpush3.bf16.msra.mxu1 %v1316_v30  ;;  %v1343_v30 = vld [vmem:[#allocation12] sm:$0xff]  }
 0x146   :  { %1200 = vmatprep.subr.bf16.mxu1 %v1535_v1 }
 0x149   :  { %1201 = vmatpush3.bf16.msra.mxu1 %v1317_v32  ;;  %v1337_v32 = vld [vmem:[#allocation12 + $0x30] sm:$0xff]  }
 0x14a   :  { %1202 = vmatprep.subr.bf16.mxu1 %v1535_v1 }
 0x14d   :  { %1203 = vmatpush3.bf16.msra.mxu1 %v1318_v38 }
 0x14e   :  { %1204 = vmatprep.subr.bf16.mxu1 %v1535_v1 }
 0x151   :  { %1205 = vmatpush3.bf16.msra.mxu1 %v1319_v40 }
 0x152   :  { %1206 = vmatprep.subr.bf16.mxu1 %v1535_v1 }
 0x155   :  { %1207 = vmatpush3.bf16.msra.mxu1 %v1320_v42 }
 0x156   :  { %1208 = vmatprep.subr.bf16.mxu1 %v1535_v1 }
 0x159   :  { %1209 = vmatpush3.bf16.msra.mxu1 %v1321_v43 }
 0x15a   :  { %1210 = vmatprep.subr.bf16.mxu1 %v1535_v1 }
 0x15d   :  { %1211 = vmatpush3.bf16.msra.mxu1 %v1323_v44 }
 0x15e   :  { %1212 = vmatprep.subr.bf16.mxu1 %v1535_v1 }
 0x161   :  { %1213 = vmatpush3.bf16.msra.mxu1 %v1325_v45 }
 0x162   :  { %1242 = vmatprep.subr.bf16.mxu1 %v1535_v1 }
 0x164   :  { %1215 = vmatmul.mubr.bf16.vlgmr.msra.gmra.mxu1 %v1680_v11 }
 0x165   :  { %1258 = vmatprep.mubr.msk.bf16.mxu1 %vm1536_vm0, %v1535_v1  ;;  %1243 = vmatpush3.bf16.msra.mxu1 %v1332_v19 }
 0x166   :  { %1244 = vmatprep.subr.bf16.mxu1 %v1535_v1 }
 0x169   :  { %1245 = vmatpush3.bf16.msra.mxu1 %v1333_v21 }
 0x16a   :  { %1246 = vmatprep.subr.bf16.mxu1 %v1535_v1 }
 0x204   :  { %v353_v28 = vpop.f32.mrf.mxu1 }
 0x205   :  { %v354_v29 = vadd.f32 %v1064_v27, %v353_v28  ;;  %v1342_v28 = vld [vmem:[#allocation12 + $0x8] sm:$0xff]  }
 0x206   :  { %v1196_v31 = vpop.f32.mrf.mxu1 }
 0x207   :  { %362 = vrot.lane.b32.xlu0 %v354_v29, %s1528_s14  ;;  %v1335_v29 = vld [vmem:[#allocation12 + $0x40] sm:$0xff]   ;;  %v1336_v31 = vld [vmem:[#allocation12 + $0x38] sm:$0xff]  }
 0x208   :  { %v356_v34 = vpop.f32.mrf.mxu1 }
 0x209   :  { %v357_v35 = vadd.f32 %v1064_v27, %v356_v34  ;;  %v1334_v27 = vld [vmem:[#allocation12 + $0x48] sm:$0xff]   ;;  %v1341_v34 = vld [vmem:[#allocation12 + $0x20] sm:$0xff]  }
 0x20a   :  { %v1197_v37 = vpop.f32.mrf.mxu1  ;;  %1247 = vmatpush3.bf16.msra.mxu1 %v1334_v27  ;;  %v1111_v27 = vld [vmem:[#allocation2] ss:$0 sm:$0xff] }
 0x20b   :  { %364 = vrot.lane.b32.xlu0 %v357_v35, %s1528_s14  ;;  %1248 = vmatprep.subr.bf16.mxu1 %v1535_v1 }
 0x20e   :  { %1249 = vmatpush3.bf16.msra.mxu1 %v1335_v29 }
 0x20f   :  { %1250 = vmatprep.subr.bf16.mxu1 %v1535_v1 }
 0x212   :  { %1251 = vmatpush3.bf16.msra.mxu1 %v1336_v31 }
 0x213   :  { %1252 = vmatprep.subr.bf16.mxu1 %v1535_v1 }
 0x216   :  { %1253 = vmatpush3.bf16.msra.mxu1 %v1337_v32 }
 0x217   :  { %1254 = vmatprep.subr.bf16.mxu1 %v1535_v1 }
 0x21a   :  { %1255 = vmatpush3.bf16.msra.mxu1 %v1339_v33 }
 0x21b   :  { %1256 = vmatprep.subr.bf16.mxu1 %v1535_v1 }
 0x21e   :  { %1257 = vmatpush3.bf16.msra.mxu1 %v1341_v34 }
 0x221   :  { %1259 = vmatmul.mubr.bf16.vlgmr.msra.gmra.mxu1 %v1680_v11  ;;  %v1345_v11 = vld [vmem:[#allocation14 + $0x10] sm:$0xff]  }
 0x224   :  { %v483_v55 = vpop.f32.mrf.mxu1 }
 0x226   :  { %v1216_v56 = vpop.f32.mrf.mxu1 }
 0x228   :  { %v486_v57 = vpop.f32.mrf.mxu1 }
 0x22a   :  { %v1217_v58 = vpop.f32.mrf.mxu1 }
 0x279   :  { %v363_v46 = vpop.permute.xlu0 %362 }
 0x27a   :  { %v368_v47 = vadd.f32 %v363_v46, %v273_v24 }
 0x27c   :  { %v372_v49 = vmul.f32 0.2, %v368_v47  ;;  %vm370_vm4 = vcmp.ge.f32.partialorder %v368_v47, 0.0 }
 0x27d   :  { %v365_v48 = vpop.permute.xlu0 %364 }
 0x27e   :  { %v369_v50 = vadd.f32 %v365_v48, %v274_v25  ;;  %v374_v52 = vsel %vm370_vm4, %v368_v47, %v372_v49  ;;  %v1340_v25 = vld [vmem:[#allocation12 + $0x10] sm:$0xff]   ;;  %v1344_v48 = vld [vmem:[#allocation14 + $0x18] sm:$0xff]  }
 0x280   :  { %v373_v51 = vmul.f32 0.2, %v369_v50  ;;  %vm371_vm5 = vcmp.ge.f32.partialorder %v369_v50, 0.0 }
 0x282   :  { %v375_v53 = vsel %vm371_vm5, %v369_v50, %v373_v51  ;;  %v1346_v50 = vld [vmem:[#allocation14 + $0x8] sm:$0xff]   ;;  %v1347_v51 = vld [vmem:[#allocation14] sm:$0xff]  }
 0x283   :  { %v376_v54 = vpack.c.bf16 %v375_v53, %v374_v52  ;;  %v1103_v53 = vld [vmem:[%s1783_s10] ss:$0 sm:$0xff] }
 0x285   :  { %491 = vrot.lane.b32.xlu1 %v376_v54, %s1528_s14 }
 0x2e1   :  { %v783_v44 = vpop.f32.mrf.mxu1 }
 0x2e3   :  { %v1260_v45 = vpop.f32.mrf.mxu1 }
 0x2e5   :  { %v786_v46 = vpop.f32.mrf.mxu1 }
 0x2e7   :  { %v1261_v47 = vpop.f32.mrf.mxu1 }
 0x2f7   :  { %v492_v60 = vpop.permute.xlu1 %491 }
 0x2f8   :  { %1227 = vmatmul.mubr.msk.bf16.vlgmr.msra.gmra.mxu0 %vm315_vm3, %v492_v60 }
 0x2f9   :  { %1231 = vmatpush3.bf16.msra.mxu0 %v1328_v59  ;;  %1238 = vmatprep.mubr.msk.bf16.mxu0 %vm1536_vm0, %v1535_v1 }
 0x2fa   :  { %1232 = vmatprep.subr.bf16.mxu0 %v1535_v1 }
 0x2fd   :  { %1233 = vmatpush3.bf16.msra.mxu0 %v1329_v61 }
 0x2fe   :  { %1234 = vmatprep.subr.bf16.mxu0 %v1535_v1 }
 0x301   :  { %1235 = vmatpush3.bf16.msra.mxu0 %v1330_v62 }
 0x302   :  { %1236 = vmatprep.subr.bf16.mxu0 %v1535_v1 }
 0x305   :  { %1237 = vmatpush3.bf16.msra.mxu0 %v1331_v63 }
 0x306   :  { %1262 = vmatprep.subr.bf16.mxu0 %v1535_v1 }
 0x3b8   :  { %v554_v0 = vpop.f32.mrf.mxu0 }
 0x3b9   :  { %v555_v3 = vadd.f32 %v554_v0, %v483_v55 }
 0x3ba   :  { %v1228_v4 = vpop.f32.mrf.mxu0 }
 0x3bb   :  { %v568_v5 = vadd.f32 %v1083_v2, %v555_v3 }
 0x3bc   :  { %v557_v6 = vpop.f32.mrf.mxu0 }
 0x3bd   :  { %v558_v7 = vadd.f32 %v557_v6, %v486_v57  ;;  %v572_v9 = vmul.f32 0.2, %v568_v5  ;;  %vm570_vm6 = vcmp.ge.f32.partialorder %v568_v5, 0.0 }
 0x3be   :  { %v1229_v8 = vpop.f32.mrf.mxu0 }
 0x3bf   :  { %v569_v10 = vadd.f32 %v1083_v2, %v558_v7  ;;  %v574_v13 = vsel %vm570_vm6, %v568_v5, %v572_v9  ;;  %v1104_v2 = vld [vmem:[%s1785_s12] ss:$0 sm:$0xff]  ;;  %s1538_s12 = smov [#allocation15]  }
 0x3c0   :  { %v1110_v7 = vld [vmem:[%s1786_s13] ss:$0 sm:$0xff]  ;;  %s1039_s13 = sshll.u32 %s1538_s12, 4  ;;  %s1040_s13 = int_to_ptr.vmem [resolvable:$true] %s1039_s13 }
 0x3c1   :  { %vm571_vm7 = vcmp.ge.f32.partialorder %v569_v10, 0.0  ;;  %v573_v12 = vmul.f32 0.2, %v569_v10  ;;  %p1501_p8 = scmp.lt.s32.totalorder %s1040_s13, %s1040_s13 }
 0x3c3   :  { %v575_v14 = vsel %vm571_vm7, %v569_v10, %v573_v12 }
 0x3c4   :  { %v576_v15 = vpack.c.bf16 %v575_v14, %v574_v13 }
 0x3c6   :  { %1239 = vmatmul.mubr.msk.bf16.vlgmr.msra.gmra.mxu0 %vm315_vm3, %v576_v15 }
 0x3c7   :  { %1270 = vmatprep.mubr.msk.bf16.mxu0 %vm1536_vm0, %v1535_v1  ;;  %1263 = vmatpush3.bf16.msra.mxu0 %v1338_v22 }
 0x3c8   :  { %1264 = vmatprep.subr.bf16.mxu0 %v1535_v1 }
 0x3cb   :  { %1265 = vmatpush3.bf16.msra.mxu0 %v1340_v25 }
 0x3cc   :  { %1266 = vmatprep.subr.bf16.mxu0 %v1535_v1 }
 0x3cf   :  { %1267 = vmatpush3.bf16.msra.mxu0 %v1342_v28 }
 0x3d0   :  { %1268 = vmatprep.subr.bf16.mxu0 %v1535_v1 }
 0x3d3   :  { %1269 = vmatpush3.bf16.msra.mxu0 %v1343_v30 }
 0x3d4   :  { %1274 = vmatprep.subr.bf16.mxu0 %v1535_v1 }
 0x486   :  { %v653_v17 = vpop.f32.mrf.mxu0 }
 0x487   :  { %v654_v18 = vadd.f32 %v1084_v16, %v653_v17 }
 0x488   :  { %v1240_v20 = vpop.f32.mrf.mxu0 }
 0x489   :  { %662 = vrot.lane.b32.xlu1 %v654_v18, %s1528_s14 }
 0x48a   :  { %v656_v23 = vpop.f32.mrf.mxu0 }
 0x48b   :  { %v657_v24 = vadd.f32 %v1084_v16, %v656_v23 }
 0x48c   :  { %v1241_v26 = vpop.f32.mrf.mxu0 }
 0x48d   :  { %664 = vrot.lane.b32.xlu0 %v657_v24, %s1528_s14  ;;  %v1537_v26 = vmov 0  }
 0x48e   :  { %1301 = vset.pattern.permute.xlu0 %v1537_v26  ;;  %1302 = vset.pattern.permute.xlu1 %v1537_v26 }
 0x4fb   :  { %v663_v35 = vpop.permute.xlu1 %662 }
 0x4fc   :  { %v668_v36 = vadd.f32 %v663_v35, %v574_v13 }
 0x4fe   :  { %v672_v38 = vmul.f32 0.2, %v668_v36  ;;  %vm670_vm8 = vcmp.ge.f32.partialorder %v668_v36, 0.0 }
 0x4ff   :  { %v665_v37 = vpop.permute.xlu0 %664 }
 0x500   :  { %v669_v39 = vadd.f32 %v665_v37, %v575_v14  ;;  %v674_v41 = vsel %vm670_vm8, %v668_v36, %v672_v38 }
 0x502   :  { %v673_v40 = vmul.f32 0.2, %v669_v39  ;;  %vm671_vm9 = vcmp.ge.f32.partialorder %v669_v39, 0.0 }
 0x504   :  { %v675_v42 = vsel %vm671_vm9, %v669_v39, %v673_v40 }
 0x505   :  { %v676_v43 = vpack.c.bf16 %v675_v42, %v674_v41 }
 0x507   :  { %791 = vrot.lane.b32.xlu1 %v676_v43, %s1528_s14 }
 0x579   :  { %v792_v49 = vpop.permute.xlu1 %791 }
 0x57a   :  { %1271 = vmatmul.mubr.msk.bf16.vlgmr.msra.gmra.mxu0 %vm315_vm3, %v792_v49 }
 0x57b   :  { %1275 = vmatpush3.bf16.msra.mxu0 %v1344_v48  ;;  %1282 = vmatprep.mubr.msk.bf16.mxu0 %vm1536_vm0, %v1535_v1 }
 0x57c   :  { %1276 = vmatprep.subr.bf16.mxu0 %v1535_v1 }
 0x57f   :  { %1277 = vmatpush3.bf16.msra.mxu0 %v1345_v11 }
 0x580   :  { %1278 = vmatprep.subr.bf16.mxu0 %v1535_v1 }
 0x583   :  { %1279 = vmatpush3.bf16.msra.mxu0 %v1346_v50 }
 0x584   :  { %1280 = vmatprep.subr.bf16.mxu0 %v1535_v1 }
 0x587   :  { %1281 = vmatpush3.bf16.msra.mxu0 %v1347_v51 }
 0x63a   :  { %v854_v52 = vpop.f32.mrf.mxu0 }
 0x63b   :  { %v855_v54 = vadd.f32 %v854_v52, %v783_v44 }
 0x63c   :  { %v1272_v55 = vpop.f32.mrf.mxu0 }
 0x63d   :  { %v868_v56 = vadd.f32 %v1103_v53, %v855_v54 }
 0x63e   :  { %v857_v57 = vpop.f32.mrf.mxu0 }
 0x63f   :  { %v858_v58 = vadd.f32 %v857_v57, %v786_v46  ;;  %v872_v60 = vmul.f32 0.2, %v868_v56  ;;  %vm870_vm10 = vcmp.ge.f32.partialorder %v868_v56, 0.0 }
 0x640   :  { %v1273_v59 = vpop.f32.mrf.mxu0 }
 0x641   :  { %v869_v61 = vadd.f32 %v1103_v53, %v858_v58  ;;  %v874_v63 = vsel %vm870_vm10, %v868_v56, %v872_v60 }
 0x643   :  { %vm871_vm11 = vcmp.ge.f32.partialorder %v869_v61, 0.0  ;;  %v873_v62 = vmul.f32 0.2, %v869_v61 }
 0x645   :  { %v875_v1 = vsel %vm871_vm11, %v869_v61, %v873_v62 }
 0x646   :  { %v876_v0 = vpack.c.bf16 %v875_v1, %v874_v63 }
 0x648   :  { %1283 = vmatmul.mubr.msk.bf16.vlgmr.msra.gmra.mxu0 %vm315_vm3, %v876_v0 }
 0x708   :  { %v953_v3 = vpop.f32.mrf.mxu0 }
 0x709   :  { %v954_v4 = vadd.f32 %v1104_v2, %v953_v3 }
 0x70a   :  { %v1284_v5 = vpop.f32.mrf.mxu0 }
 0x70b   :  { %962 = vrot.lane.b32.xlu0 %v954_v4, %s1528_s14 }
 0x70c   :  { %v956_v6 = vpop.f32.mrf.mxu0 }
 0x70d   :  { %v957_v8 = vadd.f32 %v1104_v2, %v956_v6 }
 0x70e   :  { %v1285_v9 = vpop.f32.mrf.mxu0 }
 0x70f   :  { %964 = vrot.lane.b32.xlu1 %v957_v8, %s1528_s14  ;;  %982 = vrot.lane.b32.xlu0 %v1110_v7, %s1528_s14 }
 0x77d   :  { %v963_v10 = vpop.permute.xlu0 %962 }
 0x77e   :  { %v968_v12 = vadd.f32 %v963_v10, %v874_v63 }
 0x780   :  { %v972_v13 = vmul.f32 0.2, %v968_v12  ;;  %vm970_vm12 = vcmp.ge.f32.partialorder %v968_v12, 0.0 }
 0x781   :  { %v965_v14 = vpop.permute.xlu1 %964  ;;  %v983_v15 = vpop.permute.xlu0 %982 }
 0x782   :  { %v969_v16 = vadd.f32 %v965_v14, %v875_v1  ;;  %v974_v17 = vsel %vm970_vm12, %v968_v12, %v972_v13 }
 0x783   :  { %v985_v18 = vmul.f32 %v983_v15, %v974_v17 }
 0x784   :  { %v973_v19 = vmul.f32 0.2, %v969_v16  ;;  %vm971_vm13 = vcmp.ge.f32.partialorder %v969_v16, 0.0 }
 0x785   :  { %989 = vrot.lane.b32.xlu1 %v985_v18, %s1528_s14 }
 0x786   :  { %v975_v20 = vsel %vm971_vm13, %v969_v16, %v973_v19 }
 0x787   :  { %v986_v21 = vmul.f32 %v983_v15, %v975_v20 }
 0x789   :  { %991 = vrot.lane.b32.xlu0 %v986_v21, %s1528_s14  ;;  %s1496_s14 = scalar_lea.vmem %s1040_s13, 256 }
 0x78a   :  { %p1497_p7 = scmp.ne.s32.totalorder %s1040_s13, %s1496_s14  ;;  %p1502_p9 = scmp.lt.s32.totalorder %s1496_s14, %s1496_s14 }
 0x78c   :  { %p1503_p10 = por %p1502_p9, %p1501_p8 }
 0x78e   :  { %p1504_p11 = pnand %p1503_p10, %p1497_p7 }
 0x7f7   :  { %v990_v22 = vpop.permute.xlu1 %989 }
 0x7f8   :  { %v995_v23 = vsel %vm315_vm3, %v990_v22, 0.0 }
 0x7f9   :  { %996 = vadd.xlane.f32.xlu1 %v995_v23 }
 0x7fb   :  { %v992_v24 = vpop.permute.xlu0 %991 }
 0x7fc   :  { %v998_v25 = vsel %vm315_vm3, %v992_v24, 0.0 }
 0x7fd   :  { %999 = vadd.xlane.f32.xlu0 %v998_v25 }
 0x882   :  { %v997_v28 = vpop.xlane.xlu1 %996 }
 0x883   :  { %v1008_v29 = vadd.f32 %v1111_v27, %v997_v28 }
 0x885   :  { %v1112_v30 = vmul.f32 -1.442695, %v1008_v29 }
 0x886   :  { %v1000_v31 = vpop.xlane.xlu0 %999 }
 0x887   :  { %1348 = vpow2.f32 %v1112_v30  ;;  %v1009_v32 = vadd.f32 %v1111_v27, %v1000_v31 }
 0x889   :  { %v1113_v33 = vmul.f32 -1.442695, %v1009_v32 }
 0x88b   :  { %1350 = vpow2.f32 %v1113_v33 }
 0x894   :  { %v1349_v34 = vpop.eup %1348 }
 0x895   :  { %v1016_v35 = vadd.f32 1.0, %v1349_v34 }
 0x897   :  { %1352 = vrcp.f32 %v1016_v35 }
 0x898   :  { %v1351_v36 = vpop.eup %1350 }
 0x899   :  { %v1017_v37 = vadd.f32 1.0, %v1351_v36 }
 0x89b   :  { %1354 = vrcp.f32 %v1017_v37 }
 0x8a4   :  { %v1353_v38 = vpop.eup %1352 }
 0x8a5   :  { %1024 = vperm.xlu0 %1301, %v1353_v38  }
 0x8a8   :  { %v1355_v39 = vpop.eup %1354 }
 0x8a9   :  { %1029 = vperm.xlu1 %1302, %v1355_v39  }
 0x920   :  { %v1025_v40 = vpop.permute.xlu0 %1024 }
 0x921   :  { %1032 = vst [vmem:[#allocation15] sm:$0xff] %v1025_v40 }
 0x924   :  { %v1030_v41 = vpop.permute.xlu1 %1029 }
 0x925   :  { %1033 = vst [vmem:[#allocation15 + $0x8] sm:$0xff] %v1030_v41 }
 0x926   :  { %1507 = shalt.err (!%p1504_p11)
}
 0x927   :  { %s1539_s27 = smov 128   ;;  %s1540_s28 = smov 8  }
 0x928   :  { %1045 = dma.vmem_to_hbm [thread:$0]  %s1040_s13, 256, %s1788_s15, [#allocation5], %s1539_s27, %s1539_s27, %s1540_s28  }
 0x929   :  { %1524 = dma.done.wait [#allocation5], 256  }
 0x92a   :  { %1525 = vsyncadd [#allocation5], 4294967040 }
 0x92b   :  { %1049 = vsyncpa [#allocation4], 1 }
 0x92c   :  { %1050 = vsyncpa [#allocation7], 1 }
 0x92d   :  { %1051 = vsyncpa [#allocation10], 1 }
 0x92e   :  { %1052 = vsyncpa [#allocation13], 1 }
 0x92f   :  { %1053 = vsyncpa [#allocation5], 1 }

</bundles_post_ra>
